<compile_context>
chip_gen: v7x
topology: tpu7x:2x2x1
jax: 0.10.0
libtpu: 0.0.40
codegen_flags: <defaults>
</compile_context>

<pallas_src>
import functools

import jax
import jax.numpy as jnp
from jax.experimental import pallas as pl
from jax.experimental.pallas import tpu as pltpu

NEG_INF = -9e15          # same mask value as the PyTorch code
BN_EPS = 1e-5            # PyTorch BatchNorm1d default


# ----------------------------------------------------------------------------
# small in-kernel helpers (traced jnp, VPU/XLU/EUP only)
# ----------------------------------------------------------------------------
def _leaky_relu(v, alpha):
    return jnp.where(v > 0, v, alpha * v)


def _elu(v):
    # clamp the exp argument so the dead branch never produces inf
    return jnp.where(v > 0, v, jnp.exp(jnp.minimum(v, 0.0)) - 1.0)


def _batchnorm_rows(x2d, gamma, beta, eps):
    """BatchNorm1d with batch statistics over rows of a (N, F) slab."""
    mean = jnp.mean(x2d, axis=0, keepdims=True)
    var = jnp.mean((x2d - mean) ** 2, axis=0, keepdims=True)   # biased, as PyTorch
    return (x2d - mean) * jax.lax.rsqrt(var + eps) * gamma + beta


# ----------------------------------------------------------------------------
# Single fused kernel: nheads GAT layers + per-head BN + out_att + BN1 + FFN + BN2
# ----------------------------------------------------------------------------
def _graph_attention_kernel(x_ref, wst_ref, a1_ref, a2_ref, ab_ref, bng_ref, bnb_ref,
                            wo_ref, ao1_ref, ao2_ref, aob_ref, g1_ref, be1_ref,
                            w1_ref, c1_ref, w2_ref, c2_ref, g2_ref, be2_ref,
                            out_ref, *, nheads, alpha, eps):
    B, G, d = x_ref.shape
    H = nheads
    N = B * G

    x = x_ref[...]                               # (B, G, d) f32 (dropout = identity)
    x2 = x.reshape(N, d)

    # hoisted diagonal mask (adj = ones - eye), shared by all heads and out_att
    row = jax.lax.broadcasted_iota(jnp.int32, (G, G), 0)
    col = jax.lax.broadcasted_iota(jnp.int32, (G, G), 1)
    diag = row == col

    def masked_softmax(e):
        e = jnp.where(diag, NEG_INF, e)          # mask broadcasts over leading dims
        m = jnp.max(e, axis=-1, keepdims=True)
        p = jnp.exp(e - m)
        return p / jnp.sum(p, axis=-1, keepdims=True)

    # ---------------- all attention heads, fused & head-batched ----------------
    # per-head projection: Wh[h] = x @ W_h   -> (H, N, d), bf16 MXU, f32 accumulate
    xb = jnp.broadcast_to(x2.astype(jnp.bfloat16)[None], (H, N, d))
    wh_hnd = jax.lax.dot_general(
        xb, wst_ref[...],
        dimension_numbers=(((2,), (1,)), ((0,), (0,))),
        preferred_element_type=jnp.float32)                          # (H, N, d)
    wh4 = jnp.transpose(wh_hnd.reshape(H, B, G, d), (1, 0, 2, 3))    # (B, H, G, d)

    # attention logits for all heads at once (2 vectorized reduces, bias folded in)
    f1 = jnp.sum(wh4 * a1_ref[...], axis=-1, keepdims=True)          # (B, H, G, 1)
    f2 = jnp.sum(wh4 * a2_ref[...], axis=-1)                         # (B, H, G)
    e = _leaky_relu(f1 + f2[:, :, None, :] + ab_ref[...], alpha)     # (B, H, G, G)
    attn = masked_softmax(e)                                         # f32, eval dropout = id

    # context for every head: one batched matmul over B*H, kept in f32 for parity
    ctx = jax.lax.dot_general(
        attn.reshape(B * H, G, G), wh4.reshape(B * H, G, d),
        dimension_numbers=(((2,), (1,)), ((0,), (0,))),
        preferred_element_type=jnp.float32).reshape(B, H, G, d)

    # ELU + per-head residual + per-head BatchNorm (batch statistics), all heads at once
    hcat = _elu(ctx) + x[:, None, :, :]                              # (B, H, G, d)
    mu = jnp.mean(jnp.mean(hcat, axis=0, keepdims=True), axis=2, keepdims=True)
    dev = hcat - mu
    var = jnp.mean(jnp.mean(dev * dev, axis=0, keepdims=True), axis=2, keepdims=True)
    xbn = dev * jax.lax.rsqrt(var + eps) * bng_ref[...] + bnb_ref[...]   # (B, H, G, d)
    # dropout on the concatenated head outputs: identity (eval mode)

    # ---------------- out_att (concat=False) -----------------------------------
    # concat(X_heads) @ Wo  ==  sum_h X_h @ Wo_h  (head-batched matmul + sum)
    xh = jnp.transpose(xbn, (1, 0, 2, 3)).reshape(H, N, d).astype(jnp.bfloat16)
    who = jnp.sum(jax.lax.dot_general(
        xh, wo_ref[...],
        dimension_numbers=(((2,), (1,)), ((0,), (0,))),
        preferred_element_type=jnp.float32), axis=0)                 # (N, d)
    wo3 = who.reshape(B, G, d)
    f1o = jnp.sum(wo3 * ao1_ref[...], axis=-1, keepdims=True)        # (B, G, 1)
    f2o = jnp.sum(wo3 * ao2_ref[...], axis=-1)                       # (B, G)
    eo = _leaky_relu(f1o + f2o.reshape(B, 1, G) + aob_ref[...], alpha)
    attn_o = masked_softmax(eo)                                      # (B, G, G)
    h2 = jax.lax.dot_general(
        attn_o, wo3,
        dimension_numbers=(((2,), (1,)), ((0,), (0,))),
        preferred_element_type=jnp.float32)                          # (B, G, d), f32

    # normalizer1( elu(out_att(x)) + residual1 )
    x3 = _batchnorm_rows((_elu(h2) + x).reshape(N, d), g1_ref[...], be1_ref[...], eps)

    # PositionWiseFeedForward (Linear -> ReLU -> dropout(identity) -> Linear) + residual2
    hmid = jnp.dot(x3.astype(jnp.bfloat16), w1_ref[...],
                   preferred_element_type=jnp.float32) + c1_ref[...]
    hmid = jnp.maximum(hmid, 0.0)
    y = jnp.dot(hmid.astype(jnp.bfloat16), w2_ref[...],
                preferred_element_type=jnp.float32) + c2_ref[...]

    # normalizer2
    x5 = _batchnorm_rows(y + x3, g2_ref[...], be2_ref[...], eps)
    out_ref[...] = x5.reshape(B, G, d).astype(out_ref.dtype)


def graph_attention_forward(x, packed, *, alpha, eps=BN_EPS):
    """One fused pallas_call for the whole GraphAttention forward."""
    bs, gs, d = x.shape
    H = packed["W_stack"].shape[0]
    dff = packed["W1"].shape[1]
    kernel = functools.partial(_graph_attention_kernel, nheads=H, alpha=alpha, eps=eps)

    def full(shape):
        return pl.BlockSpec(shape, lambda i: (0,) * len(shape))

    in_specs = [
        full((bs, gs, d)),          # x (also residual1)
        full((H, d, d)),            # stacked per-head W (bf16)
        full((1, H, 1, d)),         # per-head a1
        full((1, H, 1, d)),         # per-head a2
        full((1, H, 1, 1)),         # per-head a bias
        full((1, H, 1, d)),         # per-head BN gamma
        full((1, H, 1, d)),         # per-head BN beta
        full((H, d, d)),            # out_att W split by head (bf16)
        full((1, 1, d)),            # out_att a1
        full((1, 1, d)),            # out_att a2
        full((1, 1, 1)),            # out_att a bias
        full((1, d)),               # bn1 gamma
        full((1, d)),               # bn1 beta
        full((d, dff)),             # ffd W1 (bf16)
        full((1, dff)),             # ffd b1
        full((dff, d)),             # ffd W2 (bf16)
        full((1, d)),               # ffd b2
        full((1, d)),               # bn2 gamma
        full((1, d)),               # bn2 beta
    ]
    # TODO(synk): final output is only d=32 lanes wide (masked store); emit a
    # padded/flattened lane-dense layout if the downstream consumer allows it.
    return pl.pallas_call(
        kernel,
        out_shape=jax.ShapeDtypeStruct((bs, gs, d), jnp.float32),
        grid=(1,),
        in_specs=in_specs,
        out_specs=full((bs, gs, d)),
        compiler_params=pltpu.CompilerParams(dimension_semantics=("arbitrary",)),
    )(x, packed["W_stack"], packed["A1"], packed["A2"], packed["AB"],
      packed["BNG"], packed["BNB"], packed["Wo"], packed["AO1"], packed["AO2"],
      packed["AOB"], packed["BN1G"], packed["BN1B"], packed["W1"], packed["B1"],
      packed["W2"], packed["B2"], packed["BN2G"], packed["BN2B"])


# ----------------------------------------------------------------------------
# One-time parameter packing (outside the jitted forward): stack per-head
# params into head-batched layouts and pre-cast matmul weights to bf16.
# ----------------------------------------------------------------------------
def pack_params(params):
    heads = params["heads"]
    H = len(heads)
    d = heads[0]["W"].shape[0]
    op = params["out_att"]
    fp = params["ffd"]
    dff = fp["W1"].shape[1]
    packed = {
        "W_stack": jnp.stack([hp["W"] for hp in heads], 0).astype(jnp.bfloat16),   # (H,d,d)
        "A1": jnp.stack([hp["a_w"][:d, 0] for hp in heads], 0).reshape(1, H, 1, d),
        "A2": jnp.stack([hp["a_w"][d:, 0] for hp in heads], 0).reshape(1, H, 1, d),
        "AB": jnp.stack([hp["a_b"].reshape(()) for hp in heads], 0).reshape(1, H, 1, 1),
        "BNG": jnp.stack([hp["bn_g"] for hp in heads], 0).reshape(1, H, 1, d),
        "BNB": jnp.stack([hp["bn_b"] for hp in heads], 0).reshape(1, H, 1, d),
        # out_att weight split by head rows (sum_h X_h @ Wo_h == concat(X) @ Wo)
        "Wo": jnp.stack([op["W"][h * d:(h + 1) * d, :] for h in range(H)],
                        0).astype(jnp.bfloat16),                                    # (H,d,d)
        "AO1": op["a_w"][:d, 0].reshape(1, 1, d),
        "AO2": op["a_w"][d:, 0].reshape(1, 1, d),
        "AOB": op["a_b"].reshape(1, 1, 1),
        "BN1G": params["bn1_g"].reshape(1, d),
        "BN1B": params["bn1_b"].reshape(1, d),
        "W1": fp["W1"].astype(jnp.bfloat16),
        "B1": fp["b1"].reshape(1, dff),
        "W2": fp["W2"].astype(jnp.bfloat16),
        "B2": fp["b2"].reshape(1, d),
        "BN2G": params["bn2_g"].reshape(1, d),
        "BN2B": params["bn2_b"].reshape(1, d),
    }
    return packed


# ----------------------------------------------------------------------------
# Deterministic parameter init (shapes follow the module __init__)
# ----------------------------------------------------------------------------
def xavier_uniform(key, fan_in, fan_out, gain=1.414):
    a = gain * (6.0 / (fan_in + fan_out)) ** 0.5
    return jax.random.uniform(key, (fan_in, fan_out), jnp.float32, -a, a)


def init_params(key, n_hid, nheads):
    params = {"heads": []}
    for _ in range(nheads):
        key, k1, k2, k3 = jax.random.split(key, 4)
        params["heads"].append({
            "W": xavier_uniform(k1, n_hid, n_hid),                   # W.weight.T  (in_f, out_f)
            "a_w": xavier_uniform(k2, 2 * n_hid, 1),                 # a.weight.T  (2*out_f, 1)
            "a_b": jax.random.uniform(k3, (1, 1), jnp.float32, -0.1, 0.1),
            "bn_g": jnp.ones((n_hid,), jnp.float32),
            "bn_b": jnp.zeros((n_hid,), jnp.float32),
        })
    key, k1, k2, k3 = jax.random.split(key, 4)
    params["out_att"] = {
        "W": xavier_uniform(k1, n_hid * nheads, n_hid),
        "a_w": xavier_uniform(k2, 2 * n_hid, 1),
        "a_b": jax.random.uniform(k3, (1, 1), jnp.float32, -0.1, 0.1),
    }
    key, k1, k2, k3, k4 = jax.random.split(key, 5)
    params["ffd"] = {
        "W1": xavier_uniform(k1, n_hid, n_hid, gain=1.0),
        "b1": jax.random.uniform(k2, (n_hid,), jnp.float32, -0.05, 0.05),
        "W2": xavier_uniform(k3, n_hid, n_hid, gain=1.0),
        "b2": jax.random.uniform(k4, (n_hid,), jnp.float32, -0.05, 0.05),
    }
    params["bn1_g"] = jnp.ones((n_hid,), jnp.float32)
    params["bn1_b"] = jnp.zeros((n_hid,), jnp.float32)
    params["bn2_g"] = jnp.ones((n_hid,), jnp.float32)
    params["bn2_b"] = jnp.zeros((n_hid,), jnp.float32)
    return params


if __name__ == "__main__":
    bs, gs = 2, 8
    n_hid = 32            # in_features == n_hid (required by the residual adds)
    nheads = 4
    alpha = 0.2

    key = jax.random.PRNGKey(0)
    key, kx, kp = jax.random.split(key, 3)
    x = jax.random.normal(kx, (bs, gs, n_hid), jnp.float32)
    params = init_params(kp, n_hid, nheads)

    packed = pack_params(params)                      # one-time packing + bf16 pre-cast
    fwd = jax.jit(functools.partial(graph_attention_forward, alpha=alpha))
    out = fwd(x, packed)
    out = jax.block_until_ready(out)
    assert out.shape == (bs, gs, n_hid)
    assert bool(jnp.all(jnp.isfinite(out)))
    print("KERNEL_OK")
</pallas_src>

<mosaic_0001>
module attributes {stable_mosaic.version = 11 : i64} {
  func.func @_graph_attention_kernel(%arg0: i32, %arg1: memref<2x8x32xf32, #tpu.memory_space<vmem>>, %arg2: memref<4x32x32xbf16, #tpu.memory_space<vmem>>, %arg3: memref<1x4x1x32xf32, #tpu.memory_space<vmem>>, %arg4: memref<1x4x1x32xf32, #tpu.memory_space<vmem>>, %arg5: memref<1x4x1x1xf32, #tpu.memory_space<vmem>>, %arg6: memref<1x4x1x32xf32, #tpu.memory_space<vmem>>, %arg7: memref<1x4x1x32xf32, #tpu.memory_space<vmem>>, %arg8: memref<4x32x32xbf16, #tpu.memory_space<vmem>>, %arg9: memref<1x1x32xf32, #tpu.memory_space<vmem>>, %arg10: memref<1x1x32xf32, #tpu.memory_space<vmem>>, %arg11: memref<1x1x1xf32, #tpu.memory_space<vmem>>, %arg12: memref<1x32xf32, #tpu.memory_space<vmem>>, %arg13: memref<1x32xf32, #tpu.memory_space<vmem>>, %arg14: memref<32x32xbf16, #tpu.memory_space<vmem>>, %arg15: memref<1x32xf32, #tpu.memory_space<vmem>>, %arg16: memref<32x32xbf16, #tpu.memory_space<vmem>>, %arg17: memref<1x32xf32, #tpu.memory_space<vmem>>, %arg18: memref<1x32xf32, #tpu.memory_space<vmem>>, %arg19: memref<1x32xf32, #tpu.memory_space<vmem>>, %arg20: memref<2x8x32xf32, #tpu.memory_space<vmem>>) attributes {dimension_semantics = [#tpu.dimension_semantics<arbitrary>], iteration_bounds = array<i64: 1>, scalar_prefetch = 0 : i64, scratch_operands = 0 : i64, tpu.core_type = #tpu.core_type<tc>, window_params = [{pipeline_mode = #tpu.pipeline_mode<synchronous>, transform_indices = @transform_0, window_bounds = array<i64: 2, 8, 32>}, {pipeline_mode = #tpu.pipeline_mode<synchronous>, transform_indices = @transform_1, window_bounds = array<i64: 4, 32, 32>}, {pipeline_mode = #tpu.pipeline_mode<synchronous>, transform_indices = @transform_2, window_bounds = array<i64: 1, 4, 1, 32>}, {pipeline_mode = #tpu.pipeline_mode<synchronous>, transform_indices = @transform_3, window_bounds = array<i64: 1, 4, 1, 32>}, {pipeline_mode = #tpu.pipeline_mode<synchronous>, transform_indices = @transform_4, window_bounds = array<i64: 1, 4, 1, 1>}, {pipeline_mode = #tpu.pipeline_mode<synchronous>, transform_indices = @transform_5, window_bounds = array<i64: 1, 4, 1, 32>}, {pipeline_mode = #tpu.pipeline_mode<synchronous>, transform_indices = @transform_6, window_bounds = array<i64: 1, 4, 1, 32>}, {pipeline_mode = #tpu.pipeline_mode<synchronous>, transform_indices = @transform_7, window_bounds = array<i64: 4, 32, 32>}, {pipeline_mode = #tpu.pipeline_mode<synchronous>, transform_indices = @transform_8, window_bounds = array<i64: 1, 1, 32>}, {pipeline_mode = #tpu.pipeline_mode<synchronous>, transform_indices = @transform_9, window_bounds = array<i64: 1, 1, 32>}, {pipeline_mode = #tpu.pipeline_mode<synchronous>, transform_indices = @transform_10, window_bounds = array<i64: 1, 1, 1>}, {pipeline_mode = #tpu.pipeline_mode<synchronous>, transform_indices = @transform_11, window_bounds = array<i64: 1, 32>}, {pipeline_mode = #tpu.pipeline_mode<synchronous>, transform_indices = @transform_12, window_bounds = array<i64: 1, 32>}, {pipeline_mode = #tpu.pipeline_mode<synchronous>, transform_indices = @transform_13, window_bounds = array<i64: 32, 32>}, {pipeline_mode = #tpu.pipeline_mode<synchronous>, transform_indices = @transform_14, window_bounds = array<i64: 1, 32>}, {pipeline_mode = #tpu.pipeline_mode<synchronous>, transform_indices = @transform_15, window_bounds = array<i64: 32, 32>}, {pipeline_mode = #tpu.pipeline_mode<synchronous>, transform_indices = @transform_16, window_bounds = array<i64: 1, 32>}, {pipeline_mode = #tpu.pipeline_mode<synchronous>, transform_indices = @transform_17, window_bounds = array<i64: 1, 32>}, {pipeline_mode = #tpu.pipeline_mode<synchronous>, transform_indices = @transform_18, window_bounds = array<i64: 1, 32>}, {pipeline_mode = #tpu.pipeline_mode<synchronous>, transform_indices = @transform_19, window_bounds = array<i64: 2, 8, 32>}]} {
    %c0 = arith.constant 0 : index
    %c0_0 = arith.constant 0 : index
    %c0_1 = arith.constant 0 : index
    %0 = vector.load %arg1[%c0, %c0_0, %c0_1] : memref<2x8x32xf32, #tpu.memory_space<vmem>>, vector<2x8x32xf32>
    %1 = vector.shape_cast %0 : vector<2x8x32xf32> to vector<16x32xf32>
    %2 = tpu.iota {dimensions = array<i32: 0>} : vector<8x8xi32>
    %3 = tpu.iota {dimensions = array<i32: 1>} : vector<8x8xi32>
    %4 = arith.cmpi eq, %2, %3 : vector<8x8xi32>
    %5 = arith.truncf %1 : vector<16x32xf32> to vector<16x32xbf16>
    %6 = vector.shape_cast %5 : vector<16x32xbf16> to vector<1x16x32xbf16>
    %7 = vector.shape_cast %6 : vector<1x16x32xbf16> to vector<1x16x32xbf16>
    %8 = vector.broadcast %7 : vector<1x16x32xbf16> to vector<4x16x32xbf16>
    %c0_2 = arith.constant 0 : index
    %c0_3 = arith.constant 0 : index
    %c0_4 = arith.constant 0 : index
    %9 = vector.load %arg2[%c0_2, %c0_3, %c0_4] : memref<4x32x32xbf16, #tpu.memory_space<vmem>>, vector<4x32x32xbf16>
    %cst = arith.constant dense<0.000000e+00> : vector<4x16x32xf32>
    %10 = tpu.matmul %8, %9, %cst {dimension_numbers = #tpu.dot_dimension_numbers<[2], [1], [1], [2], [0, 0, 0, 1, 1, 2], [0], [0]>} : vector<4x16x32xbf16>, vector<4x32x32xbf16>, vector<4x16x32xf32> -> vector<4x16x32xf32>
    %11 = vector.shape_cast %10 : vector<4x16x32xf32> to vector<4x2x8x32xf32>
    %12 = tpu.transpose %11, [1, 0, 2, 3] : vector<4x2x8x32xf32> -> vector<2x4x8x32xf32>
    %c0_5 = arith.constant 0 : index
    %c0_6 = arith.constant 0 : index
    %c0_7 = arith.constant 0 : index
    %c0_8 = arith.constant 0 : index
    %13 = vector.load %arg3[%c0_5, %c0_6, %c0_7, %c0_8] : memref<1x4x1x32xf32, #tpu.memory_space<vmem>>, vector<1x4x1x32xf32>
    %14 = vector.broadcast %13 : vector<1x4x1x32xf32> to vector<2x4x8x32xf32>
    %15 = arith.mulf %12, %14 : vector<2x4x8x32xf32>
    %cst_9 = arith.constant dense<0.000000e+00> : vector<2x4x8xf32>
    %16 = vector.multi_reduction <add>, %15, %cst_9 [3] : vector<2x4x8x32xf32> to vector<2x4x8xf32>
    %17 = vector.shape_cast %16 : vector<2x4x8xf32> to vector<2x4x8x1xf32>
    %c0_10 = arith.constant 0 : index
    %c0_11 = arith.constant 0 : index
    %c0_12 = arith.constant 0 : index
    %c0_13 = arith.constant 0 : index
    %18 = vector.load %arg4[%c0_10, %c0_11, %c0_12, %c0_13] : memref<1x4x1x32xf32, #tpu.memory_space<vmem>>, vector<1x4x1x32xf32>
    %19 = vector.broadcast %18 : vector<1x4x1x32xf32> to vector<2x4x8x32xf32>
    %20 = arith.mulf %12, %19 : vector<2x4x8x32xf32>
    %cst_14 = arith.constant dense<0.000000e+00> : vector<2x4x8xf32>
    %21 = vector.multi_reduction <add>, %20, %cst_14 [3] : vector<2x4x8x32xf32> to vector<2x4x8xf32>
    %22 = vector.shape_cast %21 : vector<2x4x8xf32> to vector<2x4x1x8xf32>
    %23 = vector.broadcast %17 : vector<2x4x8x1xf32> to vector<2x4x8x8xf32>
    %24 = vector.broadcast %22 : vector<2x4x1x8xf32> to vector<2x4x8x8xf32>
    %25 = arith.addf %23, %24 : vector<2x4x8x8xf32>
    %c0_15 = arith.constant 0 : index
    %c0_16 = arith.constant 0 : index
    %c0_17 = arith.constant 0 : index
    %c0_18 = arith.constant 0 : index
    %26 = vector.load %arg5[%c0_15, %c0_16, %c0_17, %c0_18] : memref<1x4x1x1xf32, #tpu.memory_space<vmem>>, vector<1x4x1x1xf32>
    %27 = vector.broadcast %26 : vector<1x4x1x1xf32> to vector<2x4x8x8xf32>
    %28 = arith.addf %25, %27 : vector<2x4x8x8xf32>
    %cst_19 = arith.constant 0.000000e+00 : f32
    %29 = vector.broadcast %cst_19 : f32 to vector<2x4x8x8xf32>
    %30 = arith.cmpf ogt, %28, %29 : vector<2x4x8x8xf32>
    %cst_20 = arith.constant 2.000000e-01 : f32
    %31 = vector.broadcast %cst_20 : f32 to vector<2x4x8x8xf32>
    %32 = arith.mulf %31, %28 : vector<2x4x8x8xf32>
    %33 = arith.select %30, %28, %32 : vector<2x4x8x8xi1>, vector<2x4x8x8xf32>
    %cst_21 = arith.constant -9.000000e+15 : f32
    %34 = vector.shape_cast %4 : vector<8x8xi1> to vector<1x1x8x8xi1>
    %35 = vector.broadcast %34 : vector<1x1x8x8xi1> to vector<2x4x8x8xi1>
    %36 = vector.broadcast %cst_21 : f32 to vector<2x4x8x8xf32>
    %37 = arith.select %35, %36, %33 : vector<2x4x8x8xi1>, vector<2x4x8x8xf32>
    %cst_22 = arith.constant dense<0xFF800000> : vector<2x4x8xf32>
    %38 = vector.multi_reduction <maximumf>, %37, %cst_22 [3] : vector<2x4x8x8xf32> to vector<2x4x8xf32>
    %39 = vector.shape_cast %38 : vector<2x4x8xf32> to vector<2x4x8x1xf32>
    %40 = vector.broadcast %39 : vector<2x4x8x1xf32> to vector<2x4x8x8xf32>
    %41 = arith.subf %37, %40 : vector<2x4x8x8xf32>
    %42 = math.exp %41 : vector<2x4x8x8xf32>
    %cst_23 = arith.constant dense<0.000000e+00> : vector<2x4x8xf32>
    %43 = vector.multi_reduction <add>, %42, %cst_23 [3] : vector<2x4x8x8xf32> to vector<2x4x8xf32>
    %44 = vector.shape_cast %43 : vector<2x4x8xf32> to vector<2x4x8x1xf32>
    %45 = vector.broadcast %44 : vector<2x4x8x1xf32> to vector<2x4x8x8xf32>
    %46 = arith.divf %42, %45 : vector<2x4x8x8xf32>
    %47 = vector.shape_cast %46 : vector<2x4x8x8xf32> to vector<8x8x8xf32>
    %48 = vector.shape_cast %12 : vector<2x4x8x32xf32> to vector<8x8x32xf32>
    %cst_24 = arith.constant dense<0.000000e+00> : vector<8x8x32xf32>
    %49 = tpu.matmul %47, %48, %cst_24 {dimension_numbers = #tpu.dot_dimension_numbers<[2], [1], [1], [2], [0, 0, 0, 1, 1, 2], [0], [0]>} : vector<8x8x8xf32>, vector<8x8x32xf32>, vector<8x8x32xf32> -> vector<8x8x32xf32>
    %50 = vector.shape_cast %49 : vector<8x8x32xf32> to vector<2x4x8x32xf32>
    %cst_25 = arith.constant 0.000000e+00 : f32
    %51 = vector.broadcast %cst_25 : f32 to vector<2x4x8x32xf32>
    %52 = arith.cmpf ogt, %50, %51 : vector<2x4x8x32xf32>
    %cst_26 = arith.constant 0.000000e+00 : f32
    %53 = vector.broadcast %cst_26 : f32 to vector<2x4x8x32xf32>
    %54 = arith.minimumf %50, %53 : vector<2x4x8x32xf32>
    %55 = math.exp %54 : vector<2x4x8x32xf32>
    %cst_27 = arith.constant 1.000000e+00 : f32
    %56 = vector.broadcast %cst_27 : f32 to vector<2x4x8x32xf32>
    %57 = arith.subf %55, %56 : vector<2x4x8x32xf32>
    %58 = arith.select %52, %50, %57 : vector<2x4x8x32xi1>, vector<2x4x8x32xf32>
    %59 = vector.shape_cast %0 : vector<2x8x32xf32> to vector<2x1x8x32xf32>
    %60 = vector.broadcast %59 : vector<2x1x8x32xf32> to vector<2x4x8x32xf32>
    %61 = arith.addf %58, %60 : vector<2x4x8x32xf32>
    %cst_28 = arith.constant dense<0.000000e+00> : vector<4x8x32xf32>
    %62 = vector.multi_reduction <add>, %61, %cst_28 [0] : vector<2x4x8x32xf32> to vector<4x8x32xf32>
    %63 = vector.shape_cast %62 : vector<4x8x32xf32> to vector<1x4x8x32xf32>
    %cst_29 = arith.constant 2.000000e+00 : f32
    %64 = vector.broadcast %cst_29 : f32 to vector<1x4x8x32xf32>
    %65 = arith.divf %63, %64 : vector<1x4x8x32xf32>
    %cst_30 = arith.constant dense<0.000000e+00> : vector<1x4x32xf32>
    %66 = vector.multi_reduction <add>, %65, %cst_30 [2] : vector<1x4x8x32xf32> to vector<1x4x32xf32>
    %67 = vector.shape_cast %66 : vector<1x4x32xf32> to vector<1x4x1x32xf32>
    %cst_31 = arith.constant 8.000000e+00 : f32
    %68 = vector.broadcast %cst_31 : f32 to vector<1x4x1x32xf32>
    %69 = arith.divf %67, %68 : vector<1x4x1x32xf32>
    %70 = vector.broadcast %69 : vector<1x4x1x32xf32> to vector<2x4x8x32xf32>
    %71 = arith.subf %61, %70 : vector<2x4x8x32xf32>
    %72 = arith.mulf %71, %71 : vector<2x4x8x32xf32>
    %cst_32 = arith.constant dense<0.000000e+00> : vector<4x8x32xf32>
    %73 = vector.multi_reduction <add>, %72, %cst_32 [0] : vector<2x4x8x32xf32> to vector<4x8x32xf32>
    %74 = vector.shape_cast %73 : vector<4x8x32xf32> to vector<1x4x8x32xf32>
    %cst_33 = arith.constant 2.000000e+00 : f32
    %75 = vector.broadcast %cst_33 : f32 to vector<1x4x8x32xf32>
    %76 = arith.divf %74, %75 : vector<1x4x8x32xf32>
    %cst_34 = arith.constant dense<0.000000e+00> : vector<1x4x32xf32>
    %77 = vector.multi_reduction <add>, %76, %cst_34 [2] : vector<1x4x8x32xf32> to vector<1x4x32xf32>
    %78 = vector.shape_cast %77 : vector<1x4x32xf32> to vector<1x4x1x32xf32>
    %cst_35 = arith.constant 8.000000e+00 : f32
    %79 = vector.broadcast %cst_35 : f32 to vector<1x4x1x32xf32>
    %80 = arith.divf %78, %79 : vector<1x4x1x32xf32>
    %cst_36 = arith.constant 9.99999974E-6 : f32
    %81 = vector.broadcast %cst_36 : f32 to vector<1x4x1x32xf32>
    %82 = arith.addf %80, %81 : vector<1x4x1x32xf32>
    %83 = math.rsqrt %82 : vector<1x4x1x32xf32>
    %84 = vector.broadcast %83 : vector<1x4x1x32xf32> to vector<2x4x8x32xf32>
    %85 = arith.mulf %71, %84 : vector<2x4x8x32xf32>
    %c0_37 = arith.constant 0 : index
    %c0_38 = arith.constant 0 : index
    %c0_39 = arith.constant 0 : index
    %c0_40 = arith.constant 0 : index
    %86 = vector.load %arg6[%c0_37, %c0_38, %c0_39, %c0_40] : memref<1x4x1x32xf32, #tpu.memory_space<vmem>>, vector<1x4x1x32xf32>
    %87 = vector.broadcast %86 : vector<1x4x1x32xf32> to vector<2x4x8x32xf32>
    %88 = arith.mulf %85, %87 : vector<2x4x8x32xf32>
    %c0_41 = arith.constant 0 : index
    %c0_42 = arith.constant 0 : index
    %c0_43 = arith.constant 0 : index
    %c0_44 = arith.constant 0 : index
    %89 = vector.load %arg7[%c0_41, %c0_42, %c0_43, %c0_44] : memref<1x4x1x32xf32, #tpu.memory_space<vmem>>, vector<1x4x1x32xf32>
    %90 = vector.broadcast %89 : vector<1x4x1x32xf32> to vector<2x4x8x32xf32>
    %91 = arith.addf %88, %90 : vector<2x4x8x32xf32>
    %92 = tpu.transpose %91, [1, 0, 2, 3] : vector<2x4x8x32xf32> -> vector<4x2x8x32xf32>
    %93 = vector.shape_cast %92 : vector<4x2x8x32xf32> to vector<4x16x32xf32>
    %94 = arith.truncf %93 : vector<4x16x32xf32> to vector<4x16x32xbf16>
    %c0_45 = arith.constant 0 : index
    %c0_46 = arith.constant 0 : index
    %c0_47 = arith.constant 0 : index
    %95 = vector.load %arg8[%c0_45, %c0_46, %c0_47] : memref<4x32x32xbf16, #tpu.memory_space<vmem>>, vector<4x32x32xbf16>
    %cst_48 = arith.constant dense<0.000000e+00> : vector<4x16x32xf32>
    %96 = tpu.matmul %94, %95, %cst_48 {dimension_numbers = #tpu.dot_dimension_numbers<[2], [1], [1], [2], [0, 0, 0, 1, 1, 2], [0], [0]>} : vector<4x16x32xbf16>, vector<4x32x32xbf16>, vector<4x16x32xf32> -> vector<4x16x32xf32>
    %cst_49 = arith.constant dense<0.000000e+00> : vector<16x32xf32>
    %97 = vector.multi_reduction <add>, %96, %cst_49 [0] : vector<4x16x32xf32> to vector<16x32xf32>
    %98 = vector.shape_cast %97 : vector<16x32xf32> to vector<2x8x32xf32>
    %c0_50 = arith.constant 0 : index
    %c0_51 = arith.constant 0 : index
    %c0_52 = arith.constant 0 : index
    %99 = vector.load %arg9[%c0_50, %c0_51, %c0_52] : memref<1x1x32xf32, #tpu.memory_space<vmem>>, vector<1x1x32xf32>
    %100 = vector.broadcast %99 : vector<1x1x32xf32> to vector<2x8x32xf32>
    %101 = arith.mulf %98, %100 : vector<2x8x32xf32>
    %cst_53 = arith.constant dense<0.000000e+00> : vector<2x8xf32>
    %102 = vector.multi_reduction <add>, %101, %cst_53 [2] : vector<2x8x32xf32> to vector<2x8xf32>
    %103 = vector.shape_cast %102 : vector<2x8xf32> to vector<2x8x1xf32>
    %c0_54 = arith.constant 0 : index
    %c0_55 = arith.constant 0 : index
    %c0_56 = arith.constant 0 : index
    %104 = vector.load %arg10[%c0_54, %c0_55, %c0_56] : memref<1x1x32xf32, #tpu.memory_space<vmem>>, vector<1x1x32xf32>
    %105 = vector.broadcast %104 : vector<1x1x32xf32> to vector<2x8x32xf32>
    %106 = arith.mulf %98, %105 : vector<2x8x32xf32>
    %cst_57 = arith.constant dense<0.000000e+00> : vector<2x8xf32>
    %107 = vector.multi_reduction <add>, %106, %cst_57 [2] : vector<2x8x32xf32> to vector<2x8xf32>
    %108 = vector.shape_cast %107 : vector<2x8xf32> to vector<2x1x8xf32>
    %109 = vector.broadcast %103 : vector<2x8x1xf32> to vector<2x8x8xf32>
    %110 = vector.broadcast %108 : vector<2x1x8xf32> to vector<2x8x8xf32>
    %111 = arith.addf %109, %110 : vector<2x8x8xf32>
    %c0_58 = arith.constant 0 : index
    %c0_59 = arith.constant 0 : index
    %c0_60 = arith.constant 0 : index
    %112 = vector.load %arg11[%c0_58, %c0_59, %c0_60] : memref<1x1x1xf32, #tpu.memory_space<vmem>>, vector<1x1x1xf32>
    %113 = vector.broadcast %112 : vector<1x1x1xf32> to vector<2x8x8xf32>
    %114 = arith.addf %111, %113 : vector<2x8x8xf32>
    %cst_61 = arith.constant 0.000000e+00 : f32
    %115 = vector.broadcast %cst_61 : f32 to vector<2x8x8xf32>
    %116 = arith.cmpf ogt, %114, %115 : vector<2x8x8xf32>
    %cst_62 = arith.constant 2.000000e-01 : f32
    %117 = vector.broadcast %cst_62 : f32 to vector<2x8x8xf32>
    %118 = arith.mulf %117, %114 : vector<2x8x8xf32>
    %119 = arith.select %116, %114, %118 : vector<2x8x8xi1>, vector<2x8x8xf32>
    %cst_63 = arith.constant -9.000000e+15 : f32
    %120 = vector.shape_cast %4 : vector<8x8xi1> to vector<1x8x8xi1>
    %121 = vector.broadcast %120 : vector<1x8x8xi1> to vector<2x8x8xi1>
    %122 = vector.broadcast %cst_63 : f32 to vector<2x8x8xf32>
    %123 = arith.select %121, %122, %119 : vector<2x8x8xi1>, vector<2x8x8xf32>
    %cst_64 = arith.constant dense<0xFF800000> : vector<2x8xf32>
    %124 = vector.multi_reduction <maximumf>, %123, %cst_64 [2] : vector<2x8x8xf32> to vector<2x8xf32>
    %125 = vector.shape_cast %124 : vector<2x8xf32> to vector<2x8x1xf32>
    %126 = vector.broadcast %125 : vector<2x8x1xf32> to vector<2x8x8xf32>
    %127 = arith.subf %123, %126 : vector<2x8x8xf32>
    %128 = math.exp %127 : vector<2x8x8xf32>
    %cst_65 = arith.constant dense<0.000000e+00> : vector<2x8xf32>
    %129 = vector.multi_reduction <add>, %128, %cst_65 [2] : vector<2x8x8xf32> to vector<2x8xf32>
    %130 = vector.shape_cast %129 : vector<2x8xf32> to vector<2x8x1xf32>
    %131 = vector.broadcast %130 : vector<2x8x1xf32> to vector<2x8x8xf32>
    %132 = arith.divf %128, %131 : vector<2x8x8xf32>
    %cst_66 = arith.constant dense<0.000000e+00> : vector<2x8x32xf32>
    %133 = tpu.matmul %132, %98, %cst_66 {dimension_numbers = #tpu.dot_dimension_numbers<[2], [1], [1], [2], [0, 0, 0, 1, 1, 2], [0], [0]>} : vector<2x8x8xf32>, vector<2x8x32xf32>, vector<2x8x32xf32> -> vector<2x8x32xf32>
    %cst_67 = arith.constant 0.000000e+00 : f32
    %134 = vector.broadcast %cst_67 : f32 to vector<2x8x32xf32>
    %135 = arith.cmpf ogt, %133, %134 : vector<2x8x32xf32>
    %cst_68 = arith.constant 0.000000e+00 : f32
    %136 = vector.broadcast %cst_68 : f32 to vector<2x8x32xf32>
    %137 = arith.minimumf %133, %136 : vector<2x8x32xf32>
    %138 = math.exp %137 : vector<2x8x32xf32>
    %cst_69 = arith.constant 1.000000e+00 : f32
    %139 = vector.broadcast %cst_69 : f32 to vector<2x8x32xf32>
    %140 = arith.subf %138, %139 : vector<2x8x32xf32>
    %141 = arith.select %135, %133, %140 : vector<2x8x32xi1>, vector<2x8x32xf32>
    %142 = arith.addf %141, %0 : vector<2x8x32xf32>
    %143 = vector.shape_cast %142 : vector<2x8x32xf32> to vector<16x32xf32>
    %c0_70 = arith.constant 0 : index
    %c0_71 = arith.constant 0 : index
    %144 = vector.load %arg12[%c0_70, %c0_71] : memref<1x32xf32, #tpu.memory_space<vmem>>, vector<1x32xf32>
    %c0_72 = arith.constant 0 : index
    %c0_73 = arith.constant 0 : index
    %145 = vector.load %arg13[%c0_72, %c0_73] : memref<1x32xf32, #tpu.memory_space<vmem>>, vector<1x32xf32>
    %cst_74 = arith.constant dense<0.000000e+00> : vector<32xf32>
    %146 = vector.multi_reduction <add>, %143, %cst_74 [0] : vector<16x32xf32> to vector<32xf32>
    %147 = vector.shape_cast %146 : vector<32xf32> to vector<1x32xf32>
    %cst_75 = arith.constant 1.600000e+01 : f32
    %148 = vector.broadcast %cst_75 : f32 to vector<1x32xf32>
    %149 = arith.divf %147, %148 : vector<1x32xf32>
    %150 = vector.broadcast %149 : vector<1x32xf32> to vector<16x32xf32>
    %151 = arith.subf %143, %150 : vector<16x32xf32>
    %152 = arith.mulf %151, %151 : vector<16x32xf32>
    %cst_76 = arith.constant dense<0.000000e+00> : vector<32xf32>
    %153 = vector.multi_reduction <add>, %152, %cst_76 [0] : vector<16x32xf32> to vector<32xf32>
    %154 = vector.shape_cast %153 : vector<32xf32> to vector<1x32xf32>
    %cst_77 = arith.constant 1.600000e+01 : f32
    %155 = vector.broadcast %cst_77 : f32 to vector<1x32xf32>
    %156 = arith.divf %154, %155 : vector<1x32xf32>
    %157 = vector.broadcast %149 : vector<1x32xf32> to vector<16x32xf32>
    %158 = arith.subf %143, %157 : vector<16x32xf32>
    %cst_78 = arith.constant 9.99999974E-6 : f32
    %159 = vector.broadcast %cst_78 : f32 to vector<1x32xf32>
    %160 = arith.addf %156, %159 : vector<1x32xf32>
    %161 = math.rsqrt %160 : vector<1x32xf32>
    %162 = vector.broadcast %161 : vector<1x32xf32> to vector<16x32xf32>
    %163 = arith.mulf %158, %162 : vector<16x32xf32>
    %164 = vector.broadcast %144 : vector<1x32xf32> to vector<16x32xf32>
    %165 = arith.mulf %163, %164 : vector<16x32xf32>
    %166 = vector.broadcast %145 : vector<1x32xf32> to vector<16x32xf32>
    %167 = arith.addf %165, %166 : vector<16x32xf32>
    %168 = arith.truncf %167 : vector<16x32xf32> to vector<16x32xbf16>
    %c0_79 = arith.constant 0 : index
    %c0_80 = arith.constant 0 : index
    %169 = vector.load %arg14[%c0_79, %c0_80] : memref<32x32xbf16, #tpu.memory_space<vmem>>, vector<32x32xbf16>
    %cst_81 = arith.constant dense<0.000000e+00> : vector<16x32xf32>
    %170 = tpu.matmul %168, %169, %cst_81 {dimension_numbers = #tpu.dot_dimension_numbers<[1], [0], [0], [1], [0, 0, 1, 1], [], []>} : vector<16x32xbf16>, vector<32x32xbf16>, vector<16x32xf32> -> vector<16x32xf32>
    %c0_82 = arith.constant 0 : index
    %c0_83 = arith.constant 0 : index
    %171 = vector.load %arg15[%c0_82, %c0_83] : memref<1x32xf32, #tpu.memory_space<vmem>>, vector<1x32xf32>
    %172 = vector.broadcast %171 : vector<1x32xf32> to vector<16x32xf32>
    %173 = arith.addf %170, %172 : vector<16x32xf32>
    %cst_84 = arith.constant 0.000000e+00 : f32
    %174 = vector.broadcast %cst_84 : f32 to vector<16x32xf32>
    %175 = arith.maximumf %173, %174 : vector<16x32xf32>
    %176 = arith.truncf %175 : vector<16x32xf32> to vector<16x32xbf16>
    %c0_85 = arith.constant 0 : index
    %c0_86 = arith.constant 0 : index
    %177 = vector.load %arg16[%c0_85, %c0_86] : memref<32x32xbf16, #tpu.memory_space<vmem>>, vector<32x32xbf16>
    %cst_87 = arith.constant dense<0.000000e+00> : vector<16x32xf32>
    %178 = tpu.matmul %176, %177, %cst_87 {dimension_numbers = #tpu.dot_dimension_numbers<[1], [0], [0], [1], [0, 0, 1, 1], [], []>} : vector<16x32xbf16>, vector<32x32xbf16>, vector<16x32xf32> -> vector<16x32xf32>
    %c0_88 = arith.constant 0 : index
    %c0_89 = arith.constant 0 : index
    %179 = vector.load %arg17[%c0_88, %c0_89] : memref<1x32xf32, #tpu.memory_space<vmem>>, vector<1x32xf32>
    %180 = vector.broadcast %179 : vector<1x32xf32> to vector<16x32xf32>
    %181 = arith.addf %178, %180 : vector<16x32xf32>
    %182 = arith.addf %181, %167 : vector<16x32xf32>
    %c0_90 = arith.constant 0 : index
    %c0_91 = arith.constant 0 : index
    %183 = vector.load %arg18[%c0_90, %c0_91] : memref<1x32xf32, #tpu.memory_space<vmem>>, vector<1x32xf32>
    %c0_92 = arith.constant 0 : index
    %c0_93 = arith.constant 0 : index
    %184 = vector.load %arg19[%c0_92, %c0_93] : memref<1x32xf32, #tpu.memory_space<vmem>>, vector<1x32xf32>
    %cst_94 = arith.constant dense<0.000000e+00> : vector<32xf32>
    %185 = vector.multi_reduction <add>, %182, %cst_94 [0] : vector<16x32xf32> to vector<32xf32>
    %186 = vector.shape_cast %185 : vector<32xf32> to vector<1x32xf32>
    %cst_95 = arith.constant 1.600000e+01 : f32
    %187 = vector.broadcast %cst_95 : f32 to vector<1x32xf32>
    %188 = arith.divf %186, %187 : vector<1x32xf32>
    %189 = vector.broadcast %188 : vector<1x32xf32> to vector<16x32xf32>
    %190 = arith.subf %182, %189 : vector<16x32xf32>
    %191 = arith.mulf %190, %190 : vector<16x32xf32>
    %cst_96 = arith.constant dense<0.000000e+00> : vector<32xf32>
    %192 = vector.multi_reduction <add>, %191, %cst_96 [0] : vector<16x32xf32> to vector<32xf32>
    %193 = vector.shape_cast %192 : vector<32xf32> to vector<1x32xf32>
    %cst_97 = arith.constant 1.600000e+01 : f32
    %194 = vector.broadcast %cst_97 : f32 to vector<1x32xf32>
    %195 = arith.divf %193, %194 : vector<1x32xf32>
    %196 = vector.broadcast %188 : vector<1x32xf32> to vector<16x32xf32>
    %197 = arith.subf %182, %196 : vector<16x32xf32>
    %cst_98 = arith.constant 9.99999974E-6 : f32
    %198 = vector.broadcast %cst_98 : f32 to vector<1x32xf32>
    %199 = arith.addf %195, %198 : vector<1x32xf32>
    %200 = math.rsqrt %199 : vector<1x32xf32>
    %201 = vector.broadcast %200 : vector<1x32xf32> to vector<16x32xf32>
    %202 = arith.mulf %197, %201 : vector<16x32xf32>
    %203 = vector.broadcast %183 : vector<1x32xf32> to vector<16x32xf32>
    %204 = arith.mulf %202, %203 : vector<16x32xf32>
    %205 = vector.broadcast %184 : vector<1x32xf32> to vector<16x32xf32>
    %206 = arith.addf %204, %205 : vector<16x32xf32>
    %207 = vector.shape_cast %206 : vector<16x32xf32> to vector<2x8x32xf32>
    %c0_99 = arith.constant 0 : index
    %c0_100 = arith.constant 0 : index
    %c0_101 = arith.constant 0 : index
    %208 = vector.load %arg20[%c0_99, %c0_100, %c0_101] : memref<2x8x32xf32, #tpu.memory_space<vmem>>, vector<2x8x32xf32>
    tpu.vector_store %arg20[%c0_99, %c0_100, %c0_101], %207 {strides = array<i32>} : memref<2x8x32xf32, #tpu.memory_space<vmem>>, vector<2x8x32xf32>,
    return
  }
  func.func @transform_0(%arg0: i32) -> (i32, i32, i32) {
    %c0_i32 = arith.constant 0 : i32
    %c0_i32_0 = arith.constant 0 : i32
    %c0_i32_1 = arith.constant 0 : i32
    %c0_i32_2 = arith.constant 0 : i32
    return %c0_i32, %c0_i32_0, %c0_i32_1 : i32, i32, i32
  }
  func.func @transform_1(%arg0: i32) -> (i32, i32, i32) {
    %c0_i32 = arith.constant 0 : i32
    %c0_i32_0 = arith.constant 0 : i32
    %c0_i32_1 = arith.constant 0 : i32
    %c0_i32_2 = arith.constant 0 : i32
    return %c0_i32, %c0_i32_0, %c0_i32_1 : i32, i32, i32
  }
  func.func @transform_2(%arg0: i32) -> (i32, i32, i32, i32) {
    %c0_i32 = arith.constant 0 : i32
    %c0_i32_0 = arith.constant 0 : i32
    %c0_i32_1 = arith.constant 0 : i32
    %c0_i32_2 = arith.constant 0 : i32
    %c0_i32_3 = arith.constant 0 : i32
    return %c0_i32, %c0_i32_0, %c0_i32_1, %c0_i32_2 : i32, i32, i32, i32
  }
  func.func @transform_3(%arg0: i32) -> (i32, i32, i32, i32) {
    %c0_i32 = arith.constant 0 : i32
    %c0_i32_0 = arith.constant 0 : i32
    %c0_i32_1 = arith.constant 0 : i32
    %c0_i32_2 = arith.constant 0 : i32
    %c0_i32_3 = arith.constant 0 : i32
    return %c0_i32, %c0_i32_0, %c0_i32_1, %c0_i32_2 : i32, i32, i32, i32
  }
  func.func @transform_4(%arg0: i32) -> (i32, i32, i32, i32) {
    %c0_i32 = arith.constant 0 : i32
    %c0_i32_0 = arith.constant 0 : i32
    %c0_i32_1 = arith.constant 0 : i32
    %c0_i32_2 = arith.constant 0 : i32
    %c0_i32_3 = arith.constant 0 : i32
    return %c0_i32, %c0_i32_0, %c0_i32_1, %c0_i32_2 : i32, i32, i32, i32
  }
  func.func @transform_5(%arg0: i32) -> (i32, i32, i32, i32) {
    %c0_i32 = arith.constant 0 : i32
    %c0_i32_0 = arith.constant 0 : i32
    %c0_i32_1 = arith.constant 0 : i32
    %c0_i32_2 = arith.constant 0 : i32
    %c0_i32_3 = arith.constant 0 : i32
    return %c0_i32, %c0_i32_0, %c0_i32_1, %c0_i32_2 : i32, i32, i32, i32
  }
  func.func @transform_6(%arg0: i32) -> (i32, i32, i32, i32) {
    %c0_i32 = arith.constant 0 : i32
    %c0_i32_0 = arith.constant 0 : i32
    %c0_i32_1 = arith.constant 0 : i32
    %c0_i32_2 = arith.constant 0 : i32
    %c0_i32_3 = arith.constant 0 : i32
    return %c0_i32, %c0_i32_0, %c0_i32_1, %c0_i32_2 : i32, i32, i32, i32
  }
  func.func @transform_7(%arg0: i32) -> (i32, i32, i32) {
    %c0_i32 = arith.constant 0 : i32
    %c0_i32_0 = arith.constant 0 : i32
    %c0_i32_1 = arith.constant 0 : i32
    %c0_i32_2 = arith.constant 0 : i32
    return %c0_i32, %c0_i32_0, %c0_i32_1 : i32, i32, i32
  }
  func.func @transform_8(%arg0: i32) -> (i32, i32, i32) {
    %c0_i32 = arith.constant 0 : i32
    %c0_i32_0 = arith.constant 0 : i32
    %c0_i32_1 = arith.constant 0 : i32
    %c0_i32_2 = arith.constant 0 : i32
    return %c0_i32, %c0_i32_0, %c0_i32_1 : i32, i32, i32
  }
  func.func @transform_9(%arg0: i32) -> (i32, i32, i32) {
    %c0_i32 = arith.constant 0 : i32
    %c0_i32_0 = arith.constant 0 : i32
    %c0_i32_1 = arith.constant 0 : i32
    %c0_i32_2 = arith.constant 0 : i32
    return %c0_i32, %c0_i32_0, %c0_i32_1 : i32, i32, i32
  }
  func.func @transform_10(%arg0: i32) -> (i32, i32, i32) {
    %c0_i32 = arith.constant 0 : i32
    %c0_i32_0 = arith.constant 0 : i32
    %c0_i32_1 = arith.constant 0 : i32
    %c0_i32_2 = arith.constant 0 : i32
    return %c0_i32, %c0_i32_0, %c0_i32_1 : i32, i32, i32
  }
  func.func @transform_11(%arg0: i32) -> (i32, i32) {
    %c0_i32 = arith.constant 0 : i32
    %c0_i32_0 = arith.constant 0 : i32
    %c0_i32_1 = arith.constant 0 : i32
    return %c0_i32, %c0_i32_0 : i32, i32
  }
  func.func @transform_12(%arg0: i32) -> (i32, i32) {
    %c0_i32 = arith.constant 0 : i32
    %c0_i32_0 = arith.constant 0 : i32
    %c0_i32_1 = arith.constant 0 : i32
    return %c0_i32, %c0_i32_0 : i32, i32
  }
  func.func @transform_13(%arg0: i32) -> (i32, i32) {
    %c0_i32 = arith.constant 0 : i32
    %c0_i32_0 = arith.constant 0 : i32
    %c0_i32_1 = arith.constant 0 : i32
    return %c0_i32, %c0_i32_0 : i32, i32
  }
  func.func @transform_14(%arg0: i32) -> (i32, i32) {
    %c0_i32 = arith.constant 0 : i32
    %c0_i32_0 = arith.constant 0 : i32
    %c0_i32_1 = arith.constant 0 : i32
    return %c0_i32, %c0_i32_0 : i32, i32
  }
  func.func @transform_15(%arg0: i32) -> (i32, i32) {
    %c0_i32 = arith.constant 0 : i32
    %c0_i32_0 = arith.constant 0 : i32
    %c0_i32_1 = arith.constant 0 : i32
    return %c0_i32, %c0_i32_0 : i32, i32
  }
  func.func @transform_16(%arg0: i32) -> (i32, i32) {
    %c0_i32 = arith.constant 0 : i32
    %c0_i32_0 = arith.constant 0 : i32
    %c0_i32_1 = arith.constant 0 : i32
    return %c0_i32, %c0_i32_0 : i32, i32
  }
  func.func @transform_17(%arg0: i32) -> (i32, i32) {
    %c0_i32 = arith.constant 0 : i32
    %c0_i32_0 = arith.constant 0 : i32
    %c0_i32_1 = arith.constant 0 : i32
    return %c0_i32, %c0_i32_0 : i32, i32
  }
  func.func @transform_18(%arg0: i32) -> (i32, i32) {
    %c0_i32 = arith.constant 0 : i32
    %c0_i32_0 = arith.constant 0 : i32
    %c0_i32_1 = arith.constant 0 : i32
    return %c0_i32, %c0_i32_0 : i32, i32
  }
  func.func @transform_19(%arg0: i32) -> (i32, i32, i32) {
    %c0_i32 = arith.constant 0 : i32
    %c0_i32_0 = arith.constant 0 : i32
    %c0_i32_1 = arith.constant 0 : i32
    %c0_i32_2 = arith.constant 0 : i32
    return %c0_i32, %c0_i32_0, %c0_i32_1 : i32, i32, i32
  }
}

</mosaic_0001>

<bundles_post_ra>
// kernel: graph_attention_forward.1
= control target key start
LH: loop header
LB: loop body
LE: loop exit
PB: predicated region body
PF: predicated region fallthrough
CT: control target
= control target key end

     0   :  { %s3918_s0 = inlined_call_operand.hbm [shape: f32[2,8,32], index: 0, kind: input, shape index: {}]   ;;  %s3919_s1 = inlined_call_operand.vmem [shape: bf16[4,32,32], index: 1, kind: input, shape index: {}]   ;;  %s3920_s2 = inlined_call_operand.vmem [shape: f32[1,4,1,32], index: 2, kind: input, shape index: {}]   ;;  %s3921_s3 = inlined_call_operand.hbm [shape: f32[1,4,1,32], index: 3, kind: input, shape index: {}]   ;;  %s3922_s4 = inlined_call_operand.vmem [shape: f32[1,4,1,1], index: 4, kind: input, shape index: {}]   ;;  %s3923_s5 = inlined_call_operand.hbm [shape: f32[1,4,1,32], index: 5, kind: input, shape index: {}]   ;;  %s3924_s6 = inlined_call_operand.hbm [shape: f32[1,4,1,32], index: 6, kind: input, shape index: {}]   ;;  %s3925_s7 = inlined_call_operand.hbm [shape: bf16[4,32,32], index: 7, kind: input, shape index: {}]   ;;  %s3926_s8 = inlined_call_operand.vmem [shape: f32[1,1,32], index: 8, kind: input, shape index: {}]   ;;  %s3927_s9 = inlined_call_operand.hbm [shape: f32[1,1,32], index: 9, kind: input, shape index: {}]   ;;  %s3928_s10 = inlined_call_operand.<no memory space> [shape: f32[1,1,1], index: 10, kind: input, shape index: {}]   ;;  %s3929_s11 = inlined_call_operand.hbm [shape: f32[1,32], index: 11, kind: input, shape index: {}]   ;;  %s3930_s12 = inlined_call_operand.hbm [shape: f32[1,32], index: 12, kind: input, shape index: {}]   ;;  %s3931_s13 = inlined_call_operand.hbm [shape: bf16[32,32], index: 13, kind: input, shape index: {}]   ;;  %s3932_s14 = inlined_call_operand.hbm [shape: f32[1,32], index: 14, kind: input, shape index: {}]   ;;  %s3933_s15 = inlined_call_operand.hbm [shape: bf16[32,32], index: 15, kind: input, shape index: {}]   ;;  %s3934_s16 = inlined_call_operand.hbm [shape: f32[1,32], index: 16, kind: input, shape index: {}]   ;;  %s3935_s17 = inlined_call_operand.hbm [shape: f32[1,32], index: 17, kind: input, shape index: {}]   ;;  %s3936_s18 = inlined_call_operand.hbm [shape: f32[1,32], index: 18, kind: input, shape index: {}]   ;;  %s3937_s19 = inlined_call_operand.hbm [shape: f32[2,8,32], index: 19, kind: output, shape index: {}]  }
   0x1   :  { %3943 = sst [smem:[#allocation36_spill]] %s3918_s0  ;;  %v24_v0 = vstv %s3928_s10 }
   0x2   :  { %3944 = sst [smem:[#allocation37_spill]] %s3919_s1  ;;  %25 = vst [vmem:[#allocation2] sm:$0x1] %v24_v0 }
   0x3   :  { %3945 = sst [smem:[#allocation38_spill]] %s3920_s2 }
   0x4   :  { %3946 = sst [smem:[#allocation39_spill]] %s3921_s3 }
   0x5   :  { %3947 = sst [smem:[#allocation40_spill]] %s3937_s19 }
   0x6   :  { %26 = vsyncpa [#allocation4], 0 }
   0x7   :  { %27 = vsyncpa [#allocation7], 0 }
   0x8   :  { %28 = vsyncpa [#allocation10], 0 }
   0x9   :  { %29 = vsyncpa [#allocation13], 0 }
   0xa   :  { %30 = vsyncpa [#allocation16], 0 }
   0xb   :  { %31 = vsyncpa [#allocation19], 0 }
   0xc   :  { %32 = vsyncpa [#allocation22], 0 }
   0xd   :  { %33 = vsyncpa [#allocation25], 0 }
   0xe   :  { %34 = vsyncpa [#allocation5], 0  ;;  %s3227_s20 = smov [#allocation6]   ;;  %s3948_s2 = sld [smem:[#allocation39_spill]] }
   0xf   :  { %s56_s21 = sshll.u32 %s3227_s20, 4  ;;  %s57_s21 = int_to_ptr.vmem [resolvable:$true] %s56_s21 }
  0x14   :  { %s2879_s23 = scalar_lea.hbm %s3948_s2, 64 }
  0x15   :  { %p2880_p0 = scmp.ne.s32.totalorder %s3948_s2, %s2879_s23  ;;  %p2883_p1 = scmp.lt.u32.totalorder %s2879_s23, %s3948_s2 }
  0x17   :  { %p2885_p2 = pnand %p2883_p1, %p2880_p0 }
  0x19   :  { %2888 = shalt.err (!%p2885_p2)
}
  0x1a   :  { %s2889_s26 = scalar_lea.vmem %s57_s21, 64  ;;  %p2894_p4 = scmp.lt.s32.totalorder %s57_s21, %s57_s21 }
  0x1b   :  { %p2890_p3 = scmp.ne.s32.totalorder %s57_s21, %s2889_s26  ;;  %p2895_p5 = scmp.lt.s32.totalorder %s2889_s26, %s2889_s26 }
  0x1d   :  { %p2896_p6 = por %p2895_p5, %p2894_p4 }
  0x1f   :  { %p2897_p7 = pnand %p2896_p6, %p2890_p3 }
  0x21   :  { %2900 = shalt.err (!%p2897_p7)
}
  0x22   :  { %s3228_s27 = smov 16   ;;  %s3229_s28 = smov 1  }
  0x23   :  { %62 = dma.hbm_to_vmem [thread:$0]  %s3948_s2, 64, %s57_s21, [#allocation7], %s3228_s27, %s3228_s27, %s3229_s28  }
  0x24   :  { %s3230_s30 = smov [#allocation9]   ;;  %s3231_s1 = smov [#allocation12]  }
  0x25   :  { %s82_s20 = sshll.u32 %s3230_s30, 4  ;;  %s109_s22 = sshll.u32 %s3231_s1, 4  ;;  %s83_s20 = int_to_ptr.vmem [resolvable:$true] %s82_s20  ;;  %s110_s22 = int_to_ptr.vmem [resolvable:$true] %s109_s22 }
  0x26   :  { %s2901_s25 = scalar_lea.hbm %s3924_s6, 64 }
  0x27   :  { %p2902_p8 = scmp.ne.s32.totalorder %s3924_s6, %s2901_s25  ;;  %p2905_p9 = scmp.lt.u32.totalorder %s2901_s25, %s3924_s6 }
  0x29   :  { %p2907_p10 = pnand %p2905_p9, %p2902_p8 }
  0x2b   :  { %2910 = shalt.err (!%p2907_p10)
}
  0x2c   :  { %s2911_s21 = scalar_lea.vmem %s83_s20, 64  ;;  %p2916_p12 = scmp.lt.s32.totalorder %s83_s20, %s83_s20 }
  0x2d   :  { %p2912_p11 = scmp.ne.s32.totalorder %s83_s20, %s2911_s21  ;;  %p2917_p13 = scmp.lt.s32.totalorder %s2911_s21, %s2911_s21 }
  0x2f   :  { %p2918_p0 = por %p2917_p13, %p2916_p12 }
  0x31   :  { %p2919_p1 = pnand %p2918_p0, %p2912_p11 }
  0x33   :  { %2922 = shalt.err (!%p2919_p1)
}
  0x34   :  { %88 = dma.hbm_to_vmem [thread:$0]  %s3924_s6, 64, %s83_s20, [#allocation10], %s3228_s27, %s3228_s27, %s3229_s28  }
  0x35   :  { %s2923_s30 = scalar_lea.hbm %s3927_s9, 16 }
  0x36   :  { %p2924_p2 = scmp.ne.s32.totalorder %s3927_s9, %s2923_s30  ;;  %p2927_p3 = scmp.lt.u32.totalorder %s2923_s30, %s3927_s9 }
  0x38   :  { %p2929_p4 = pnand %p2927_p3, %p2924_p2 }
  0x3a   :  { %2932 = shalt.err (!%p2929_p4)
}
  0x3b   :  { %s2933_s10 = scalar_lea.vmem %s110_s22, 16  ;;  %s2937_s3 = scalar_lea.vmem %s110_s22, 32 }
  0x3c   :  { %p2934_p5 = scmp.ne.s32.totalorder %s110_s22, %s2933_s10  ;;  %p2938_p6 = scmp.lt.s32.totalorder %s110_s22, %s110_s22 }
  0x3d   :  { %p2939_p7 = scmp.lt.s32.totalorder %s2937_s3, %s2933_s10 }
  0x3f   :  { %p2940_p8 = por %p2939_p7, %p2938_p6 }
  0x41   :  { %p2941_p9 = pnand %p2940_p8, %p2934_p5 }
  0x43   :  { %2944 = shalt.err (!%p2941_p9)
}
  0x44   :  { %112 = dma.hbm_to_vmem [thread:$0]  %s3927_s9, 16, %s110_s22, [#allocation13]  }
  0x45   :  { %s3232_s26 = smov [#allocation15]   ;;  %s3233_s2 = smov [#allocation18]  }
  0x46   :  { %s131_s21 = sshll.u32 %s3232_s26, 4  ;;  %s153_s29 = sshll.u32 %s3233_s2, 4  ;;  %s132_s21 = int_to_ptr.vmem [resolvable:$true] %s131_s21  ;;  %s154_s29 = int_to_ptr.vmem [resolvable:$true] %s153_s29 }
  0x47   :  { %s2945_s30 = scalar_lea.hbm %s3930_s12, 16 }
  0x48   :  { %p2946_p10 = scmp.ne.s32.totalorder %s3930_s12, %s2945_s30  ;;  %p2949_p11 = scmp.lt.u32.totalorder %s2945_s30, %s3930_s12 }
  0x4a   :  { %p2951_p12 = pnand %p2949_p11, %p2946_p10 }
  0x4c   :  { %2954 = shalt.err (!%p2951_p12)
}
  0x4d   :  { %s2955_s9 = scalar_lea.vmem %s132_s21, 16  ;;  %s2959_s22 = scalar_lea.vmem %s132_s21, 32 }
  0x4e   :  { %p2956_p13 = scmp.ne.s32.totalorder %s132_s21, %s2955_s9  ;;  %p2960_p0 = scmp.lt.s32.totalorder %s132_s21, %s132_s21 }
  0x4f   :  { %p2961_p1 = scmp.lt.s32.totalorder %s2959_s22, %s2955_s9 }
  0x51   :  { %p2962_p2 = por %p2961_p1, %p2960_p0 }
  0x53   :  { %p2963_p3 = pnand %p2962_p2, %p2956_p13 }
  0x55   :  { %2966 = shalt.err (!%p2963_p3)
}
  0x56   :  { %134 = dma.hbm_to_vmem [thread:$0]  %s3930_s12, 16, %s132_s21, [#allocation16]  }
  0x57   :  { %s2967_s26 = scalar_lea.hbm %s3932_s14, 16 }
  0x58   :  { %p2968_p4 = scmp.ne.s32.totalorder %s3932_s14, %s2967_s26  ;;  %p2971_p5 = scmp.lt.u32.totalorder %s2967_s26, %s3932_s14 }
  0x5a   :  { %p2973_p6 = pnand %p2971_p5, %p2968_p4 }
  0x5c   :  { %2976 = shalt.err (!%p2973_p6)
}
  0x5d   :  { %s2977_s1 = scalar_lea.vmem %s154_s29, 16  ;;  %s2981_s23 = scalar_lea.vmem %s154_s29, 32 }
  0x5e   :  { %p2978_p7 = scmp.ne.s32.totalorder %s154_s29, %s2977_s1  ;;  %p2982_p8 = scmp.lt.s32.totalorder %s154_s29, %s154_s29 }
  0x5f   :  { %p2983_p9 = scmp.lt.s32.totalorder %s2981_s23, %s2977_s1 }
  0x61   :  { %p2984_p10 = por %p2983_p9, %p2982_p8 }
  0x63   :  { %p2985_p11 = pnand %p2984_p10, %p2978_p7 }
  0x65   :  { %2988 = shalt.err (!%p2985_p11)
}
  0x66   :  { %156 = dma.hbm_to_vmem [thread:$0]  %s3932_s14, 16, %s154_s29, [#allocation19]  }
  0x67   :  { %s3234_s24 = smov [#allocation21]   ;;  %s3235_s9 = smov [#allocation3]  }
  0x68   :  { %s175_s25 = sshll.u32 %s3234_s24, 4  ;;  %s40_s22 = sshll.u32 %s3235_s9, 4  ;;  %s176_s25 = int_to_ptr.vmem [resolvable:$true] %s175_s25  ;;  %s41_s22 = int_to_ptr.vmem [resolvable:$true] %s40_s22 }
  0x69   :  { %s2989_s6 = scalar_lea.hbm %s3934_s16, 16 }
  0x6a   :  { %p2990_p12 = scmp.ne.s32.totalorder %s3934_s16, %s2989_s6  ;;  %p2993_p13 = scmp.lt.u32.totalorder %s2989_s6, %s3934_s16 }
  0x6c   :  { %p2995_p0 = pnand %p2993_p13, %p2990_p12 }
  0x6e   :  { %2998 = shalt.err (!%p2995_p0)
}
  0x6f   :  { %s2999_s14 = scalar_lea.vmem %s176_s25, 16  ;;  %s3003_s29 = scalar_lea.vmem %s176_s25, 32 }
  0x70   :  { %p3000_p1 = scmp.ne.s32.totalorder %s176_s25, %s2999_s14  ;;  %p3004_p2 = scmp.lt.s32.totalorder %s176_s25, %s176_s25 }
  0x71   :  { %p3005_p3 = scmp.lt.s32.totalorder %s3003_s29, %s2999_s14 }
  0x73   :  { %p3006_p4 = por %p3005_p3, %p3004_p2 }
  0x75   :  { %p3007_p5 = pnand %p3006_p4, %p3000_p1 }
  0x77   :  { %3010 = shalt.err (!%p3007_p5)
}
  0x78   :  { %178 = dma.hbm_to_vmem [thread:$0]  %s3934_s16, 16, %s176_s25, [#allocation22]  }
  0x79   :  { %s3949_s12 = sld [smem:[#allocation36_spill]] }
  0x7f   :  { %s3011_s21 = scalar_lea.hbm %s3949_s12, 256 }
  0x80   :  { %p3012_p6 = scmp.ne.s32.totalorder %s3949_s12, %s3011_s21  ;;  %p3015_p7 = scmp.lt.u32.totalorder %s3011_s21, %s3949_s12 }
  0x82   :  { %p3017_p8 = pnand %p3015_p7, %p3012_p6 }
  0x84   :  { %3020 = shalt.err (!%p3017_p8)
}
  0x85   :  { %s3021_s6 = scalar_lea.vmem %s41_s22, 256  ;;  %p3026_p10 = scmp.lt.s32.totalorder %s41_s22, %s41_s22 }
  0x86   :  { %p3022_p9 = scmp.ne.s32.totalorder %s41_s22, %s3021_s6  ;;  %p3027_p11 = scmp.lt.s32.totalorder %s3021_s6, %s3021_s6 }
  0x88   :  { %p3028_p12 = por %p3027_p11, %p3026_p10 }
  0x8a   :  { %p3029_p13 = pnand %p3028_p12, %p3022_p9 }
  0x8c   :  { %3032 = shalt.err (!%p3029_p13)
}
  0x8d   :  { %s3236_s16 = smov 128   ;;  %s3237_s25 = smov 8  }
  0x8e   :  { %46 = dma.hbm_to_vmem [thread:$0]  %s3949_s12, 256, %s41_s22, [#allocation4], %s3236_s16, %s3236_s16, %s3237_s25  }
  0x8f   :  { %s3238_s2 = smov [#allocation8]   ;;  %s3239_s14 = smov [#allocation11]  }
  0x90   :  { %s70_s0 = sshll.u32 %s3238_s2, 4  ;;  %s94_s29 = sshll.u32 %s3239_s14, 4  ;;  %s71_s0 = int_to_ptr.vmem [resolvable:$true] %s70_s0  ;;  %s95_s29 = int_to_ptr.vmem [resolvable:$true] %s94_s29 }
  0x91   :  { %s3033_s1 = scalar_lea.hbm %s3923_s5, 64 }
  0x92   :  { %p3034_p0 = scmp.ne.s32.totalorder %s3923_s5, %s3033_s1  ;;  %p3037_p1 = scmp.lt.u32.totalorder %s3033_s1, %s3923_s5 }
  0x94   :  { %p3039_p2 = pnand %p3037_p1, %p3034_p0 }
  0x96   :  { %3042 = shalt.err (!%p3039_p2)
}
  0x97   :  { %s3043_s22 = scalar_lea.vmem %s71_s0, 64  ;;  %p3048_p4 = scmp.lt.s32.totalorder %s71_s0, %s71_s0 }
  0x98   :  { %p3044_p3 = scmp.ne.s32.totalorder %s71_s0, %s3043_s22  ;;  %p3049_p5 = scmp.lt.s32.totalorder %s3043_s22, %s3043_s22 }
  0x9a   :  { %p3050_p6 = por %p3049_p5, %p3048_p4 }
  0x9c   :  { %p3051_p7 = pnand %p3050_p6, %p3044_p3 }
  0x9e   :  { %3054 = shalt.err (!%p3051_p7)
}
  0x9f   :  { %76 = dma.hbm_to_vmem [thread:$0]  %s3923_s5, 64, %s71_s0, [#allocation7], %s3228_s27, %s3228_s27, %s3229_s28  }
  0xa0   :  { %s3055_s20 = scalar_lea.hbm %s3925_s7, 1024 }
  0xa1   :  { %p3056_p8 = scmp.ne.s32.totalorder %s3925_s7, %s3055_s20  ;;  %p3059_p9 = scmp.lt.u32.totalorder %s3055_s20, %s3925_s7 }
  0xa3   :  { %p3061_p10 = pnand %p3059_p9, %p3056_p8 }
  0xa5   :  { %3064 = shalt.err (!%p3061_p10)
}
  0xa6   :  { %s3065_s30 = scalar_lea.vmem %s95_s29, 1024  ;;  %p3070_p12 = scmp.lt.s32.totalorder %s95_s29, %s95_s29 }
  0xa7   :  { %p3066_p11 = scmp.ne.s32.totalorder %s95_s29, %s3065_s30  ;;  %p3071_p13 = scmp.lt.s32.totalorder %s3065_s30, %s3065_s30 }
  0xa9   :  { %p3072_p0 = por %p3071_p13, %p3070_p12 }
  0xab   :  { %p3073_p1 = pnand %p3072_p0, %p3066_p11 }
  0xad   :  { %3076 = shalt.err (!%p3073_p1)
}
  0xae   :  { %s3240_s5 = smov 64   ;;  %s3241_s27 = smov 4  }
  0xaf   :  { %100 = dma.hbm_to_vmem [thread:$0]  %s3925_s7, 1024, %s95_s29, [#allocation10], %s3240_s5, %s3240_s5, %s3241_s27  }
  0xb0   :  { %s3242_s1 = smov [#allocation14]   ;;  %s3243_s21 = smov [#allocation17]  }
  0xb1   :  { %s121_s23 = sshll.u32 %s3242_s1, 4  ;;  %s140_s24 = sshll.u32 %s3243_s21, 4  ;;  %s122_s23 = int_to_ptr.vmem [resolvable:$true] %s121_s23  ;;  %s141_s24 = int_to_ptr.vmem [resolvable:$true] %s140_s24 }
  0xb2   :  { %s3077_s12 = scalar_lea.hbm %s3929_s11, 16 }
  0xb3   :  { %p3078_p2 = scmp.ne.s32.totalorder %s3929_s11, %s3077_s12  ;;  %p3081_p3 = scmp.lt.u32.totalorder %s3077_s12, %s3929_s11 }
  0xb5   :  { %p3083_p4 = pnand %p3081_p3, %p3078_p2 }
  0xb7   :  { %3086 = shalt.err (!%p3083_p4)
}
  0xb8   :  { %s3087_s7 = scalar_lea.vmem %s122_s23, 16  ;;  %s3091_s29 = scalar_lea.vmem %s122_s23, 32 }
  0xb9   :  { %p3088_p5 = scmp.ne.s32.totalorder %s122_s23, %s3087_s7  ;;  %p3092_p6 = scmp.lt.s32.totalorder %s122_s23, %s122_s23 }
  0xba   :  { %p3093_p7 = scmp.lt.s32.totalorder %s3091_s29, %s3087_s7 }
  0xbc   :  { %p3094_p8 = por %p3093_p7, %p3092_p6 }
  0xbe   :  { %p3095_p9 = pnand %p3094_p8, %p3088_p5 }
  0xc0   :  { %3098 = shalt.err (!%p3095_p9)
}
  0xc1   :  { %124 = dma.hbm_to_vmem [thread:$0]  %s3929_s11, 16, %s122_s23, [#allocation13]  }
  0xc2   :  { %s3099_s30 = scalar_lea.hbm %s3931_s13, 256 }
  0xc3   :  { %p3100_p10 = scmp.ne.s32.totalorder %s3931_s13, %s3099_s30  ;;  %p3103_p11 = scmp.lt.u32.totalorder %s3099_s30, %s3931_s13 }
  0xc5   :  { %p3105_p12 = pnand %p3103_p11, %p3100_p10 }
  0xc7   :  { %3108 = shalt.err (!%p3105_p12)
}
  0xc8   :  { %s3109_s9 = scalar_lea.vmem %s141_s24, 256  ;;  %p3114_p0 = scmp.lt.s32.totalorder %s141_s24, %s141_s24 }
  0xc9   :  { %p3110_p13 = scmp.ne.s32.totalorder %s141_s24, %s3109_s9  ;;  %p3115_p1 = scmp.lt.s32.totalorder %s3109_s9, %s3109_s9 }
  0xcb   :  { %p3116_p2 = por %p3115_p1, %p3114_p0 }
  0xcd   :  { %p3117_p3 = pnand %p3116_p2, %p3110_p13 }
  0xcf   :  { %3120 = shalt.err (!%p3117_p3)
}
  0xd0   :  { %146 = dma.hbm_to_vmem [thread:$0]  %s3931_s13, 256, %s141_s24, [#allocation16], %s3240_s5, %s3240_s5, %s3241_s27  }
  0xd1   :  { %s3244_s22 = smov [#allocation20]   ;;  %s3245_s10 = smov [#allocation23]  }
  0xd2   :  { %s162_s12 = sshll.u32 %s3244_s22, 4  ;;  %s185_s3 = sshll.u32 %s3245_s10, 4  ;;  %s163_s12 = int_to_ptr.vmem [resolvable:$true] %s162_s12  ;;  %s186_s3 = int_to_ptr.vmem [resolvable:$true] %s185_s3 }
  0xd3   :  { %s3121_s7 = scalar_lea.hbm %s3933_s15, 256 }
  0xd4   :  { %p3122_p4 = scmp.ne.s32.totalorder %s3933_s15, %s3121_s7  ;;  %p3125_p5 = scmp.lt.u32.totalorder %s3121_s7, %s3933_s15 }
  0xd6   :  { %p3127_p6 = pnand %p3125_p5, %p3122_p4 }
  0xd8   :  { %3130 = shalt.err (!%p3127_p6)
}
  0xd9   :  { %s3131_s13 = scalar_lea.vmem %s163_s12, 256  ;;  %p3136_p8 = scmp.lt.s32.totalorder %s163_s12, %s163_s12 }
  0xda   :  { %p3132_p7 = scmp.ne.s32.totalorder %s163_s12, %s3131_s13  ;;  %p3137_p9 = scmp.lt.s32.totalorder %s3131_s13, %s3131_s13 }
  0xdc   :  { %p3138_p10 = por %p3137_p9, %p3136_p8 }
  0xde   :  { %p3139_p11 = pnand %p3138_p10, %p3132_p7 }
  0xe0   :  { %3142 = shalt.err (!%p3139_p11)
}
  0xe1   :  { %168 = dma.hbm_to_vmem [thread:$0]  %s3933_s15, 256, %s163_s12, [#allocation19], %s3240_s5, %s3240_s5, %s3241_s27  }
  0xe2   :  { %s3143_s0 = scalar_lea.hbm %s3935_s17, 16 }
  0xe3   :  { %p3144_p12 = scmp.ne.s32.totalorder %s3935_s17, %s3143_s0  ;;  %p3147_p13 = scmp.lt.u32.totalorder %s3143_s0, %s3935_s17 }
  0xe5   :  { %p3149_p0 = pnand %p3147_p13, %p3144_p12 }
  0xe7   :  { %3152 = shalt.err (!%p3149_p0)
}
  0xe8   :  { %s3153_s23 = scalar_lea.vmem %s186_s3, 16  ;;  %s3157_s22 = scalar_lea.vmem %s186_s3, 32 }
  0xe9   :  { %p3154_p1 = scmp.ne.s32.totalorder %s186_s3, %s3153_s23  ;;  %p3158_p2 = scmp.lt.s32.totalorder %s186_s3, %s186_s3 }
  0xea   :  { %p3159_p3 = scmp.lt.s32.totalorder %s3157_s22, %s3153_s23 }
  0xec   :  { %p3160_p4 = por %p3159_p3, %p3158_p2 }
  0xee   :  { %p3161_p5 = pnand %p3160_p4, %p3154_p1 }
  0xf0   :  { %3164 = shalt.err (!%p3161_p5)
}
  0xf1   :  { %188 = dma.hbm_to_vmem [thread:$0]  %s3935_s17, 16, %s186_s3, [#allocation22]  }
  0xf2   :  { %s3246_s27 = smov [#allocation24]   ;;  %s3165_s20 = scalar_lea.hbm %s3936_s18, 16 }
  0xf3   :  { %s195_s12 = sshll.u32 %s3246_s27, 4  ;;  %p3166_p6 = scmp.ne.s32.totalorder %s3936_s18, %s3165_s20  ;;  %s196_s12 = int_to_ptr.vmem [resolvable:$true] %s195_s12 }
  0xf4   :  { %p3169_p7 = scmp.lt.u32.totalorder %s3165_s20, %s3936_s18 }
  0xf6   :  { %p3171_p8 = pnand %p3169_p7, %p3166_p6 }
  0xf8   :  { %3174 = shalt.err (!%p3171_p8)
}
  0xf9   :  { %s3175_s14 = scalar_lea.vmem %s196_s12, 16  ;;  %s3179_s17 = scalar_lea.vmem %s196_s12, 32 }
  0xfa   :  { %p3176_p9 = scmp.ne.s32.totalorder %s196_s12, %s3175_s14  ;;  %p3180_p10 = scmp.lt.s32.totalorder %s196_s12, %s196_s12 }
  0xfb   :  { %p3181_p11 = scmp.lt.s32.totalorder %s3179_s17, %s3175_s14 }
  0xfd   :  { %p3182_p12 = por %p3181_p11, %p3180_p10 }
  0xff   :  { %p3183_p13 = pnand %p3182_p12, %p3176_p9 }
 0x101   :  { %3186 = shalt.err (!%p3183_p13)
}
 0x102   :  { %198 = dma.hbm_to_vmem [thread:$0]  %s3936_s18, 16, %s196_s12, [#allocation25]  }
 0x103   :  { %3209 = dma.done.wait [#allocation4], 256  }
 0x104   :  { %3210 = vsyncadd [#allocation4], 4294967040 }
 0x105   :  { %3211 = dma.done.wait [#allocation7], 128  }
 0x106   :  { %3212 = vsyncadd [#allocation7], 4294967168 }
 0x107   :  { %3213 = dma.done.wait [#allocation10], 1088  }
 0x108   :  { %3214 = vsyncadd [#allocation10], 4294966208 }
 0x109   :  { %3215 = dma.done.wait [#allocation13], 32  }
 0x10a   :  { %3216 = vsyncadd [#allocation13], 4294967264 }
 0x10b   :  { %3217 = dma.done.wait [#allocation16], 272  }
 0x10c   :  { %3218 = vsyncadd [#allocation16], 4294967024 }
 0x10d   :  { %3219 = dma.done.wait [#allocation19], 272  }
 0x10e   :  { %3220 = vsyncadd [#allocation19], 4294967024 }
 0x10f   :  { %3221 = dma.done.wait [#allocation22], 32  }
 0x110   :  { %3222 = vsyncadd [#allocation22], 4294967264 }
 0x111   :  { %3223 = dma.done.wait [#allocation25], 16  }
 0x112   :  { %3224 = vsyncadd [#allocation25], 4294967280  ;;  %v3247_v1 = vmov 0.0   ;;  %vm3248_vm0 = vmmov 0   ;;  %v3249_v2 = vmov 0   ;;  %s3950_s19 = sld [smem:[#allocation37_spill]] }
 0x113   :  { %2629 = vmatprep.subr.bf16.mxu0 %v3247_v1  ;;  %2637 = vmatprep.subr.bf16.mxu1 %v3247_v1  ;;  %v3563_v7 = vld [vmem:[#allocation3] sm:$0xff]  ;;  %v3565_v8 = vld [vmem:[#allocation3 + $0x8] sm:$0xff]  ;;  %vm278_vm1 = vcmask 261120   ;;  %v2520_v13 = vld [vmem:[%s3922_s4] ss:$0 sm:$0xff]  ;;  %s3951_s3 = sld [smem:[#allocation38_spill]] }
 0x114   :  { %2633 = vmatprep.mubr.msk.bf16.mxu0 %vm3248_vm0, %v3247_v1  ;;  %2641 = vmatprep.mubr.msk.bf16.mxu1 %vm3248_vm0, %v3247_v1  ;;  %v249_v9 = vpack.c.bf16 %v3565_v8, %v3563_v7  ;;  %v2522_v15 = vld [vmem:[%s3922_s4 + $0x2] ss:$0 sm:$0xff]  ;;  %v2521_v16 = vld [vmem:[%s3922_s4 + $0x1] ss:$0 sm:$0xff]  ;;  %v2516_v17 = vld [vmem:[#allocation6] ss:$0 sm:$0xff] }
 0x115   :  { %2783 = vset.pattern.permute.xlu1 %v3249_v2  ;;  %2784 = vset.pattern.permute.xlu0 %v3249_v2  ;;  %v2517_v18 = vld [vmem:[#allocation6 + $0x1] ss:$0 sm:$0xff]  ;;  %v2518_v56 = vld [vmem:[#allocation6 + $0x2] ss:$0 sm:$0xff]  ;;  %v2519_v62 = vld [vmem:[#allocation6 + $0x3] ss:$0 sm:$0xff] }
 0x116   :  { %737 = vperm.xlu1 %2783, %v2520_v13   ;;  %741 = vperm.xlu0 %2784, %v2521_v16   ;;  %vm794_vm4 = vcmask 64512  }
 0x118   :  { %v2785_v3 = vld [vmem:[%s3950_s19] sm:$0xff]   ;;  %v2786_v4 = vld [vmem:[%s3950_s19 + $0x10] sm:$0xff]   ;;  %v2787_v5 = vld [vmem:[%s3950_s19 + $0x8] sm:$0xff]  }
 0x119   :  { %2630 = vmatpush3.bf16.msra.mxu0 %v2785_v3  ;;  %2638 = vmatpush3.bf16.msra.mxu1 %v2786_v4  ;;  %v2788_v6 = vld [vmem:[%s3950_s19 + $0x18] sm:$0xff]   ;;  %v2789_v10 = vld [vmem:[%s3950_s19 + $0x20] sm:$0xff]   ;;  %v2791_v11 = vld [vmem:[%s3950_s19 + $0x30] sm:$0xff]  }
 0x11a   :  { %2631 = vmatprep.subr.bf16.mxu0 %v3247_v1  ;;  %2639 = vmatprep.subr.bf16.mxu1 %v3247_v1  ;;  %v2790_v12 = vld [vmem:[%s3950_s19 + $0x28] sm:$0xff]   ;;  %v2792_v14 = vld [vmem:[%s3950_s19 + $0x38] sm:$0xff]   ;;  %v2513_v19 = vld [vmem:[%s3951_s3 + $0x1] ss:$0 sm:$0xff] }
 0x11b   :  { %745 = vperm.xlu1 %2783, %v2522_v15   ;;  %v2512_v21 = vld [vmem:[%s3951_s3] ss:$0 sm:$0xff]  ;;  %v2514_v38 = vld [vmem:[%s3951_s3 + $0x2] ss:$0 sm:$0xff]  ;;  %v2515_v48 = vld [vmem:[%s3951_s3 + $0x3] ss:$0 sm:$0xff] }
 0x11d   :  { %2632 = vmatpush3.bf16.msra.mxu0 %v2787_v5  ;;  %2640 = vmatpush3.bf16.msra.mxu1 %v2788_v6 }
 0x11e   :  { %2645 = vmatprep.subr.bf16.mxu0 %v3247_v1  ;;  %2653 = vmatprep.subr.bf16.mxu1 %v3247_v1 }
 0x120   :  { %2634 = vmatmul.mubr.msk.bf16.vlgmr.msra.gmra.mrb[0].mxu0 %vm278_vm1, %v249_v9  ;;  %2642 = vmatmul.mubr.msk.bf16.vlgmr.msra.gmra.mrb[0].mxu1 %vm278_vm1, %v249_v9 }
 0x121   :  { %2646 = vmatpush3.bf16.msra.mxu0 %v2789_v10  ;;  %2654 = vmatpush3.bf16.msra.mxu1 %v2791_v11  ;;  %v2523_v11 = vld [vmem:[%s3922_s4 + $0x3] ss:$0 sm:$0xff] }
 0x122   :  { %2647 = vmatprep.subr.bf16.mxu0 %v3247_v1  ;;  %2649 = vmatprep.mubr.msk.bf16.mxu0 %vm3248_vm0, %v3247_v1 }
 0x123   :  { %2655 = vmatprep.subr.bf16.mxu1 %v3247_v1  ;;  %2657 = vmatprep.mubr.msk.bf16.mxu1 %vm3248_vm0, %v3247_v1 }
 0x125   :  { %2648 = vmatpush3.bf16.msra.mxu0 %v2790_v12  ;;  %2656 = vmatpush3.bf16.msra.mxu1 %v2792_v14  ;;  %v244_v14 = vlaneseq }
 0x126   :  { %2661 = vmatprep.subr.mxu0 %v3247_v1  ;;  %2666 = vmatprep.subr.mxu1 %v3247_v1 }
 0x127   :  { %v245_v16 = vshrl.u32 %v244_v14, 7 }
 0x128   :  { %2650 = vmatmul.mubr.msk.bf16.vlgmr.msra.gmra.mrb[4].mxu0 %vm278_vm1, %v249_v9  ;;  %2658 = vmatmul.mubr.msk.bf16.vlgmr.msra.gmra.mrb[4].mxu1 %vm278_vm1, %v249_v9 }
 0x129   :  { %2663 = vmatprep.mubr.msk.f32.mxu0 %vm3248_vm0, %v3247_v1  ;;  %2668 = vmatprep.mubr.msk.f32.mxu1 %vm3248_vm0, %v3247_v1 }
 0x195   :  { %v738_v13 = vpop.permute.xlu1 %737 }
 0x19a   :  { %v3665_v15 = vpop.permute.xlu1 %745 }
 0x1f3   :  { %v316_v20 = vpop.f32.mrb[0].mxu0  ;;  %v369_v22 = vpop.f32.mrb[0].mxu1 }
 0x1f4   :  { %v2635_v23 = vpop.f32.mrb[1].mxu0  ;;  %2662 = vmatpush3.msra.mxu0 %v316_v20  ;;  %v570_v24 = vmul.f32 %v2516_v17, %v316_v20  ;;  %v571_v26 = vmul.f32 %v2517_v18, %v369_v22  ;;  %v511_v27 = vmul.f32 %v2513_v19, %v369_v22  ;;  %v2643_v28 = vpop.f32.mrb[1].mxu1  ;;  %2667 = vmatpush3.msra.mxu1 %v369_v22 }
 0x1f5   :  { %v3614_v25 = vpop.f32.mrb[2].mxu0  ;;  %2671 = vmatprep.subr.mxu0 %v3247_v1  ;;  %v510_v31 = vmul.f32 %v2512_v21, %v316_v20  ;;  %v3618_v32 = vpop.f32.mrb[2].mxu1  ;;  %2676 = vmatprep.subr.mxu1 %v3247_v1 }
 0x1f6   :  { %v2636_v29 = vpop.f32.mrb[3].mxu0  ;;  %v578_v30 = vsel %vm278_vm1, %v570_v24, 0.0  ;;  %v581_v33 = vsel %vm278_vm1, %v571_v26, 0.0  ;;  %v2644_v34 = vpop.f32.mrb[3].mxu1  ;;  %v521_v35 = vsel %vm278_vm1, %v511_v27, 0.0  ;;  %v574_v37 = vmul.f32 %v2516_v17, %v3614_v25 }
 0x1f7   :  { %579 = vadd.xlane.f32.xlu0 %v578_v30  ;;  %582 = vadd.xlane.f32.xlu1 %v581_v33  ;;  %v518_v36 = vsel %vm278_vm1, %v510_v31, 0.0  ;;  %v514_v39 = vmul.f32 %v2512_v21, %v3614_v25  ;;  %v575_v47 = vmul.f32 %v2517_v18, %v3618_v32  ;;  %v515_v58 = vmul.f32 %v2513_v19, %v3618_v32  ;;  %v742_v18 = vpop.permute.xlu0 %741 }
 0x1f8   :  { %v590_v46 = vsel %vm278_vm1, %v574_v37, 0.0  ;;  %v247_v17 = vand.u32 127, %v244_v14 }
 0x1f9   :  { %v530_v52 = vsel %vm278_vm1, %v514_v39, 0.0  ;;  %v593_v57 = vsel %vm278_vm1, %v575_v47, 0.0  ;;  %v533_v63 = vsel %vm278_vm1, %v515_v58, 0.0 }
 0x1fa   :  { %v3667_v19 = vsub.s32 %v247_v17, %v245_v16  ;;  %vm3672_vm2 = vcmp.eq.s32.totalorder %v245_v16, %v247_v17 }
 0x1fb   :  { %519 = vadd.xlane.f32.xlu0 %v518_v36  ;;  %v3629_v40 = vpop.f32.mrb[4].mxu0  ;;  %522 = vadd.xlane.f32.xlu1 %v521_v35  ;;  %v3631_v41 = vpop.f32.mrb[4].mxu1 }
 0x1fc   :  { %v2651_v42 = vpop.f32.mrb[5].mxu0  ;;  %v512_v43 = vmul.f32 %v2514_v38, %v3629_v40  ;;  %v2659_v45 = vpop.f32.mrb[5].mxu1  ;;  %v513_v55 = vmul.f32 %v2515_v48, %v3631_v41  ;;  %v572_v59 = vmul.f32 %v2518_v56, %v3629_v40  ;;  %v573_v2 = vmul.f32 %v2519_v62, %v3631_v41 }
 0x1fd   :  { %v3634_v44 = vpop.f32.mrb[6].mxu0  ;;  %v3641_v50 = vpop.f32.mrb[6].mxu1 }
 0x1fe   :  { %v2652_v49 = vpop.f32.mrb[7].mxu0  ;;  %v516_v51 = vmul.f32 %v2514_v38, %v3634_v44  ;;  %v2660_v53 = vpop.f32.mrb[7].mxu1  ;;  %v524_v54 = vsel %vm278_vm1, %v512_v43, 0.0  ;;  %v527_v60 = vsel %vm278_vm1, %v513_v55, 0.0  ;;  %v576_v61 = vmul.f32 %v2518_v56, %v3634_v44 }
 0x1ff   :  { %591 = vadd.xlane.f32.xlu0 %v590_v46  ;;  %531 = vadd.xlane.f32.xlu1 %v530_v52  ;;  %v584_v0 = vsel %vm278_vm1, %v572_v59, 0.0  ;;  %v577_v4 = vmul.f32 %v2519_v62, %v3641_v50  ;;  %v587_v5 = vsel %vm278_vm1, %v573_v2, 0.0  ;;  %v517_v9 = vmul.f32 %v2515_v48, %v3641_v50 }
 0x200   :  { %v596_v3 = vsel %vm278_vm1, %v576_v61, 0.0  ;;  %v536_v12 = vsel %vm278_vm1, %v516_v51, 0.0 }
 0x201   :  { %v599_v6 = vsel %vm278_vm1, %v577_v4, 0.0  ;;  %v539_v10 = vsel %vm278_vm1, %v517_v9, 0.0 }
 0x203   :  { %594 = vadd.xlane.f32.xlu0 %v593_v57  ;;  %525 = vadd.xlane.f32.xlu1 %v524_v54 }
 0x207   :  { %534 = vadd.xlane.f32.xlu0 %v533_v63  ;;  %528 = vadd.xlane.f32.xlu1 %v527_v60 }
 0x20b   :  { %585 = vadd.xlane.f32.xlu0 %v584_v0  ;;  %597 = vadd.xlane.f32.xlu1 %v596_v3 }
 0x20f   :  { %588 = vadd.xlane.f32.xlu0 %v587_v5  ;;  %600 = vadd.xlane.f32.xlu1 %v599_v6 }
 0x213   :  { %540 = vadd.xlane.f32.xlu1 %v539_v10 }
 0x225   :  { %749 = vperm.xlu0 %2784, %v2523_v11  }
 0x244   :  { %537 = vadd.xlane.f32.xlu0 %v536_v12 }
 0x284   :  { %v580_v20 = vpop.xlane.xlu0 %579  ;;  %v583_v21 = vpop.xlane.xlu1 %582 }
 0x285   :  { %v617_v22 = vrot.slane %v583_v21, %v3667_v19  ;;  %v613_v23 = vrot.slane %v580_v20, %v3667_v19 }
 0x288   :  { %v520_v24 = vpop.xlane.xlu0 %519  ;;  %v523_v26 = vpop.xlane.xlu1 %522 }
 0x289   :  { %v704_v27 = vadd.f32 %v613_v23, %v520_v24  ;;  %v705_v28 = vadd.f32 %v617_v22, %v523_v26 }
 0x28b   :  { %v752_v29 = vadd.f32 %v738_v13, %v704_v27  ;;  %v753_v30 = vadd.f32 %v742_v18, %v705_v28 }
 0x28c   :  { %v592_v31 = vpop.xlane.xlu0 %591  ;;  %v532_v34 = vpop.xlane.xlu1 %531 }
 0x28d   :  { %v629_v33 = vrot.slane %v592_v31, %v3667_v19  ;;  %vm760_vm3 = vcmp.gt.f32.partialorder %v752_v29, 0.0  ;;  %v768_v36 = vmul.f32 0.2, %v752_v29  ;;  %vm761_vm5 = vcmp.gt.f32.partialorder %v753_v30, 0.0 }
 0x28e   :  { %v769_v37 = vmul.f32 0.2, %v753_v30 }
 0x28f   :  { %v708_v38 = vadd.f32 %v629_v33, %v532_v34  ;;  %v776_v39 = vsel %vm760_vm3, %v752_v29, %v768_v36 }
 0x290   :  { %v595_v42 = vpop.xlane.xlu0 %594  ;;  %v3678_v43 = vsel %vm3672_vm2, -9e+15, %v776_v39  ;;  %v777_v45 = vsel %vm761_vm5, %v753_v30, %v769_v37  ;;  %v526_v47 = vpop.xlane.xlu1 %525 }
 0x291   :  { %v756_v46 = vadd.f32 %v738_v13, %v708_v38  ;;  %v795_v48 = vsel %vm794_vm4, %v3678_v43, -inf  ;;  %v3684_v49 = vsel %vm3672_vm2, -9e+15, %v777_v45  ;;  %v633_v61 = vrot.slane %v595_v42, %v3667_v19 }
 0x292   :  { %796 = vmax.xlane.f32.xlu1 %v795_v48  ;;  %v798_v54 = vsel %vm794_vm4, %v3684_v49, -inf }
 0x293   :  { %vm764_vm6 = vcmp.gt.f32.partialorder %v756_v46, 0.0  ;;  %v772_v51 = vmul.f32 0.2, %v756_v46 }
 0x294   :  { %v535_v52 = vpop.xlane.xlu0 %534  ;;  %v529_v53 = vpop.xlane.xlu1 %528 }
 0x295   :  { %v780_v55 = vsel %vm764_vm6, %v756_v46, %v772_v51  ;;  %v709_v0 = vadd.f32 %v633_v61, %v535_v52 }
 0x296   :  { %799 = vmax.xlane.f32.xlu1 %v798_v54  ;;  %v3690_v56 = vsel %vm3672_vm2, -9e+15, %v780_v55 }
 0x297   :  { %v807_v60 = vsel %vm794_vm4, %v3690_v56, -inf  ;;  %v757_v6 = vadd.f32 %v742_v18, %v709_v0 }
 0x298   :  { %v586_v57 = vpop.xlane.xlu0 %585  ;;  %v598_v59 = vpop.xlane.xlu1 %597 }
 0x299   :  { %v621_v58 = vrot.slane %v586_v57, %v3667_v19  ;;  %v773_v22 = vmul.f32 0.2, %v757_v6  ;;  %vm765_vm8 = vcmp.gt.f32.partialorder %v757_v6, 0.0  ;;  %v637_v36 = vrot.slane %v598_v59, %v3667_v19 }
 0x29a   :  { %808 = vmax.xlane.f32.xlu1 %v807_v60 }
 0x29b   :  { %v706_v62 = vadd.f32 %v621_v58, %v526_v47  ;;  %v781_v26 = vsel %vm765_vm8, %v757_v6, %v773_v22 }
 0x29c   :  { %v589_v63 = vpop.xlane.xlu0 %588  ;;  %v601_v3 = vpop.xlane.xlu1 %600  ;;  %v791_v29 = vsel %vm3672_vm2, -9e+15, %v781_v26 }
 0x29d   :  { %v754_v2 = vadd.f32 %v3665_v15, %v706_v62  ;;  %v625_v4 = vrot.slane %v589_v63, %v3667_v19  ;;  %v641_v9 = vrot.slane %v601_v3, %v3667_v19  ;;  %v810_v31 = vsel %vm794_vm4, %v791_v29, -inf }
 0x29f   :  { %vm762_vm7 = vcmp.gt.f32.partialorder %v754_v2, 0.0  ;;  %v770_v5 = vmul.f32 0.2, %v754_v2  ;;  %v707_v13 = vadd.f32 %v625_v4, %v529_v53 }
 0x2a0   :  { %v541_v10 = vpop.xlane.xlu1 %540 }
 0x2a1   :  { %v778_v11 = vsel %vm762_vm7, %v754_v2, %v770_v5  ;;  %v711_v14 = vadd.f32 %v641_v9, %v541_v10 }
 0x2a2   :  { %v788_v12 = vsel %vm3672_vm2, -9e+15, %v778_v11 }
 0x2a3   :  { %v801_v16 = vsel %vm794_vm4, %v788_v12, -inf }
 0x2a4   :  { %v750_v17 = vpop.permute.xlu0 %749  ;;  %802 = vmax.xlane.f32.xlu1 %v801_v16 }
 0x2a5   :  { %v755_v20 = vadd.f32 %v750_v17, %v707_v13  ;;  %v759_v21 = vadd.f32 %v750_v17, %v711_v14 }
 0x2a7   :  { %v771_v23 = vmul.f32 0.2, %v755_v20  ;;  %vm763_vm9 = vcmp.gt.f32.partialorder %v755_v20, 0.0  ;;  %v775_v18 = vmul.f32 0.2, %v759_v21  ;;  %vm767_vm10 = vcmp.gt.f32.partialorder %v759_v21, 0.0 }
 0x2a9   :  { %v779_v24 = vsel %vm763_vm9, %v755_v20, %v771_v23  ;;  %v783_v30 = vsel %vm767_vm10, %v759_v21, %v775_v18 }
 0x2aa   :  { %v789_v27 = vsel %vm3672_vm2, -9e+15, %v779_v24  ;;  %v793_v33 = vsel %vm3672_vm2, -9e+15, %v783_v30 }
 0x2ab   :  { %v804_v28 = vsel %vm794_vm4, %v789_v27, -inf  ;;  %v816_v34 = vsel %vm794_vm4, %v793_v33, -inf }
 0x2ac   :  { %805 = vmax.xlane.f32.xlu1 %v804_v28 }
 0x2b0   :  { %811 = vmax.xlane.f32.xlu1 %v810_v31 }
 0x2b4   :  { %817 = vmax.xlane.f32.xlu1 %v816_v34 }
 0x2d1   :  { %v538_v37 = vpop.xlane.xlu0 %537 }
 0x2d2   :  { %v710_v38 = vadd.f32 %v637_v36, %v538_v37 }
 0x2d4   :  { %v758_v39 = vadd.f32 %v3665_v15, %v710_v38 }
 0x2d6   :  { %vm766_vm11 = vcmp.gt.f32.partialorder %v758_v39, 0.0  ;;  %v774_v42 = vmul.f32 0.2, %v758_v39 }
 0x2d8   :  { %v782_v45 = vsel %vm766_vm11, %v758_v39, %v774_v42 }
 0x2d9   :  { %v792_v46 = vsel %vm3672_vm2, -9e+15, %v782_v45 }
 0x2da   :  { %v813_v47 = vsel %vm794_vm4, %v792_v46, -inf }
 0x2db   :  { %814 = vmax.xlane.f32.xlu0 %v813_v47 }
 0x31f   :  { %v797_v48 = vpop.xlane.xlu1 %796 }
 0x320   :  { %v819_v51 = vsub.f32 %v3678_v43, %v797_v48 }
 0x322   :  { %v827_v52 = vmul.f32 1.442695, %v819_v51 }
 0x323   :  { %v800_v53 = vpop.xlane.xlu1 %799 }
 0x324   :  { %2805 = vpow2.f32 %v827_v52  ;;  %v820_v54 = vsub.f32 %v3684_v49, %v800_v53 }
 0x326   :  { %v829_v55 = vmul.f32 1.442695, %v820_v54 }
 0x327   :  { %v809_v15 = vpop.xlane.xlu1 %808 }
 0x328   :  { %2807 = vpow2.f32 %v829_v55  ;;  %v823_v59 = vsub.f32 %v3690_v56, %v809_v15  ;;  %v2794_v15 = vld [vmem:[#allocation11 + $0x8] sm:$0xff]  }
 0x32a   :  { %v835_v43 = vmul.f32 1.442695, %v823_v59 }
 0x32e   :  { %v2806_v57 = vpop.eup %2805 }
 0x32f   :  { %v843_v58 = vsel %vm794_vm4, %v2806_v57, 0.0 }
 0x330   :  { %844 = vadd.xlane.f32.xlu0 %v843_v58  ;;  %v2796_v58 = vld [vmem:[#allocation11 + $0x18] sm:$0xff]  }
 0x331   :  { %v803_v60 = vpop.xlane.xlu1 %802 }
 0x332   :  { %v2808_v61 = vpop.eup %2807  ;;  %v821_v62 = vsub.f32 %v788_v12, %v803_v60 }
 0x333   :  { %v846_v63 = vsel %vm794_vm4, %v2808_v61, 0.0 }
 0x334   :  { %v831_v0 = vmul.f32 1.442695, %v821_v62  ;;  %847 = vadd.xlane.f32.xlu1 %v846_v63 }
 0x336   :  { %2809 = vpow2.f32 %v831_v0 }
 0x337   :  { %2811 = vpow2.f32 %v835_v43 }
 0x339   :  { %v806_v49 = vpop.xlane.xlu1 %805 }
 0x33a   :  { %v822_v2 = vsub.f32 %v789_v27, %v806_v49 }
 0x33c   :  { %v833_v3 = vmul.f32 1.442695, %v822_v2 }
 0x33d   :  { %v812_v4 = vpop.xlane.xlu1 %811 }
 0x33e   :  { %2813 = vpow2.f32 %v833_v3  ;;  %v824_v5 = vsub.f32 %v791_v29, %v812_v4 }
 0x340   :  { %v2810_v6 = vpop.eup %2809  ;;  %v837_v9 = vmul.f32 1.442695, %v824_v5 }
 0x341   :  { %v818_v56 = vpop.xlane.xlu1 %817  ;;  %v849_v10 = vsel %vm794_vm4, %v2810_v6, 0.0  ;;  %v2812_v11 = vpop.eup %2811 }
 0x342   :  { %2815 = vpow2.f32 %v837_v9  ;;  %v826_v12 = vsub.f32 %v793_v33, %v818_v56  ;;  %850 = vadd.xlane.f32.xlu0 %v849_v10  ;;  %v855_v14 = vsel %vm794_vm4, %v2812_v11, 0.0 }
 0x344   :  { %v841_v13 = vmul.f32 1.442695, %v826_v12 }
 0x346   :  { %2817 = vpow2.f32 %v841_v13  ;;  %856 = vadd.xlane.f32.xlu0 %v855_v14 }
 0x348   :  { %v2814_v16 = vpop.eup %2813 }
 0x349   :  { %v852_v17 = vsel %vm794_vm4, %v2814_v16, 0.0 }
 0x34a   :  { %853 = vadd.xlane.f32.xlu1 %v852_v17 }
 0x34c   :  { %v2816_v20 = vpop.eup %2815 }
 0x34d   :  { %v858_v21 = vsel %vm794_vm4, %v2816_v20, 0.0 }
 0x34e   :  { %859 = vadd.xlane.f32.xlu1 %v858_v21 }
 0x350   :  { %v2818_v22 = vpop.eup %2817 }
 0x351   :  { %v864_v23 = vsel %vm794_vm4, %v2818_v22, 0.0 }
 0x352   :  { %865 = vadd.xlane.f32.xlu1 %v864_v23 }
 0x368   :  { %v815_v18 = vpop.xlane.xlu0 %814 }
 0x369   :  { %v825_v24 = vsub.f32 %v792_v46, %v815_v18 }
 0x36b   :  { %v839_v26 = vmul.f32 1.442695, %v825_v24 }
 0x36d   :  { %2819 = vpow2.f32 %v839_v26 }
 0x377   :  { %v2820_v27 = vpop.eup %2819 }
 0x378   :  { %v861_v28 = vsel %vm794_vm4, %v2820_v27, 0.0 }
 0x379   :  { %862 = vadd.xlane.f32.xlu0 %v861_v28 }
 0x3bd   :  { %v845_v29 = vpop.xlane.xlu0 %844 }
 0x3be   :  { %2821 = vrcp.f32 %v845_v29 }
 0x3c1   :  { %v848_v30 = vpop.xlane.xlu1 %847 }
 0x3c2   :  { %2823 = vrcp.f32 %v848_v30 }
 0x3c8   :  { %v2822_v31 = vpop.eup %2821 }
 0x3c9   :  { %v868_v33 = vmul.f32 %v2822_v31, %v2806_v57  ;;  %v2795_v57 = vld [vmem:[#allocation11 + $0x10] sm:$0xff]  }
 0x3cb   :  { %2664 = vmatmul.mubr.msk.f32.vlgmr.msra.gmra.mrb[8].mxu0 %vm794_vm4, %v868_v33 }
 0x3cc   :  { %v2824_v34 = vpop.eup %2823  ;;  %2672 = vmatpush3.msra.mxu0 %v3629_v40  ;;  %2673 = vmatprep.mubr.msk.f32.mxu0 %vm3248_vm0, %v3247_v1 }
 0x3cd   :  { %v870_v36 = vmul.f32 %v2824_v34, %v2808_v61  ;;  %2681 = vmatprep.subr.mxu0 %v3247_v1 }
 0x3cf   :  { %2669 = vmatmul.mubr.msk.f32.vlgmr.msra.gmra.mrb[8].mxu1 %vm794_vm4, %v870_v36  ;;  %v851_v37 = vpop.xlane.xlu0 %850 }
 0x3d0   :  { %2677 = vmatpush3.msra.mxu1 %v3631_v41  ;;  %2825 = vrcp.f32 %v851_v37  ;;  %2678 = vmatprep.mubr.msk.f32.mxu1 %vm3248_vm0, %v3247_v1 }
 0x3d1   :  { %2686 = vmatprep.subr.mxu1 %v3247_v1 }
 0x3d3   :  { %v857_v38 = vpop.xlane.xlu0 %856 }
 0x3d4   :  { %2827 = vrcp.f32 %v857_v38 }
 0x3d7   :  { %v854_v40 = vpop.xlane.xlu1 %853 }
 0x3d8   :  { %2829 = vrcp.f32 %v854_v40 }
 0x3da   :  { %v2826_v39 = vpop.eup %2825 }
 0x3db   :  { %v872_v42 = vmul.f32 %v2826_v39, %v2810_v6  ;;  %v860_v45 = vpop.xlane.xlu1 %859 }
 0x3dc   :  { %2831 = vrcp.f32 %v860_v45 }
 0x3dd   :  { %2674 = vmatmul.mubr.msk.f32.vlgmr.msra.gmra.mrb[10].mxu0 %vm794_vm4, %v872_v42 }
 0x3de   :  { %v2828_v46 = vpop.eup %2827  ;;  %2682 = vmatpush3.msra.mxu0 %v3614_v25  ;;  %2683 = vmatprep.mubr.msk.f32.mxu0 %vm3248_vm0, %v3247_v1 }
 0x3df   :  { %v876_v41 = vmul.f32 %v2828_v46, %v2812_v11  ;;  %v866_v47 = vpop.xlane.xlu1 %865  ;;  %2691 = vmatprep.subr.mxu0 %v3247_v1 }
 0x3e0   :  { %2833 = vrcp.f32 %v866_v47 }
 0x3e1   :  { %2684 = vmatmul.mubr.msk.f32.vlgmr.msra.gmra.mrb[12].mxu0 %vm794_vm4, %v876_v41 }
 0x3e2   :  { %v2830_v48 = vpop.eup %2829  ;;  %2692 = vmatpush3.msra.mxu0 %v3634_v44  ;;  %2693 = vmatprep.mubr.msk.f32.mxu0 %vm3248_vm0, %v3247_v1 }
 0x3e3   :  { %v874_v51 = vmul.f32 %v2830_v48, %v2814_v16  ;;  %2701 = vmatprep.subr.bf16.mxu0 %v3247_v1 }
 0x3e5   :  { %2679 = vmatmul.mubr.msk.f32.vlgmr.msra.gmra.mrb[10].mxu1 %vm794_vm4, %v874_v51 }
 0x3e6   :  { %v2832_v25 = vpop.eup %2831  ;;  %2687 = vmatpush3.msra.mxu1 %v3618_v32  ;;  %2688 = vmatprep.mubr.msk.f32.mxu1 %vm3248_vm0, %v3247_v1 }
 0x3e7   :  { %v878_v52 = vmul.f32 %v2832_v25, %v2816_v20  ;;  %2696 = vmatprep.subr.mxu1 %v3247_v1 }
 0x3e9   :  { %2689 = vmatmul.mubr.msk.f32.vlgmr.msra.gmra.mrb[12].mxu1 %vm794_vm4, %v878_v52 }
 0x3ea   :  { %v2834_v44 = vpop.eup %2833  ;;  %2697 = vmatpush3.msra.mxu1 %v3641_v50  ;;  %2698 = vmatprep.mubr.msk.f32.mxu1 %vm3248_vm0, %v3247_v1  ;;  %v2793_v50 = vld [vmem:[#allocation11] sm:$0xff]  }
 0x3eb   :  { %v882_v53 = vmul.f32 %v2834_v44, %v2818_v22  ;;  %2709 = vmatprep.subr.bf16.mxu1 %v3247_v1 }
 0x3ed   :  { %2699 = vmatmul.mubr.msk.f32.vlgmr.msra.gmra.mrb[14].mxu1 %vm794_vm4, %v882_v53 }
 0x3ee   :  { %2713 = vmatprep.mubr.msk.bf16.mxu1 %vm3248_vm0, %v3247_v1  ;;  %2710 = vmatpush3.bf16.msra.mxu1 %v2795_v57 }
 0x3ef   :  { %2711 = vmatprep.subr.bf16.mxu1 %v3247_v1 }
 0x3f2   :  { %2712 = vmatpush3.bf16.msra.mxu1 %v2796_v58 }
 0x3f3   :  { %2725 = vmatprep.subr.bf16.mxu1 %v3247_v1 }
 0x406   :  { %v863_v32 = vpop.xlane.xlu0 %862 }
 0x407   :  { %2835 = vrcp.f32 %v863_v32 }
 0x411   :  { %v2836_v54 = vpop.eup %2835 }
 0x412   :  { %v880_v55 = vmul.f32 %v2836_v54, %v2820_v27 }
 0x414   :  { %2694 = vmatmul.mubr.msk.f32.vlgmr.msra.gmra.mrb[14].mxu0 %vm794_vm4, %v880_v55 }
 0x415   :  { %2705 = vmatprep.mubr.msk.bf16.mxu0 %vm3248_vm0, %v3247_v1  ;;  %2702 = vmatpush3.bf16.msra.mxu0 %v2793_v50 }
 0x416   :  { %2703 = vmatprep.subr.bf16.mxu0 %v3247_v1 }
 0x419   :  { %2704 = vmatpush3.bf16.msra.mxu0 %v2794_v15 }
 0x41a   :  { %2717 = vmatprep.subr.bf16.mxu0 %v3247_v1 }
 0x49e   :  { %v952_v59 = vpop.f32.mrb[8].mxu0 }
 0x49f   :  { %v2665_v60 = vpop.f32.mrb[9].mxu0  ;;  %v1475_v63 = vmin.f32 %v952_v59, 0.0  ;;  %vm1467_vm12 = vcmp.gt.f32.partialorder %v952_v59, 0.0 }
 0x4a1   :  { %v1483_v43 = vmul.f32 1.442695, %v1475_v63 }
 0x4a2   :  { %v1025_v61 = vpop.f32.mrb[8].mxu1 }
 0x4a3   :  { %v2670_v62 = vpop.f32.mrb[9].mxu1  ;;  %v1476_v0 = vmin.f32 %v1025_v61, 0.0  ;;  %2837 = vpow2.f32 %v1483_v43  ;;  %vm1468_vm14 = vcmp.gt.f32.partialorder %v1025_v61, 0.0 }
 0x4a5   :  { %v1485_v3 = vmul.f32 1.442695, %v1476_v0 }
 0x4a7   :  { %2839 = vpow2.f32 %v1485_v3 }
 0x4ad   :  { %v2838_v12 = vpop.eup %2837 }
 0x4ae   :  { %v2532_v20 = vadd.f32 -1.0, %v2838_v12 }
 0x4b0   :  { %v3767_v49 = vpop.f32.mrb[10].mxu0  ;;  %v1507_v26 = vsel %vm1467_vm12, %v952_v59, %v2532_v20 }
 0x4b1   :  { %v2675_v2 = vpop.f32.mrb[11].mxu0  ;;  %v2840_v24 = vpop.eup %2839  ;;  %v1515_v30 = vadd.f32 %v1507_v26, %v3563_v7  ;;  %vm1469_vm6 = vcmp.gt.f32.partialorder %v3767_v49, 0.0 }
 0x4b2   :  { %v2533_v31 = vadd.f32 -1.0, %v2840_v24 }
 0x4b3   :  { %v1523_v37 = vsel %vm278_vm1, %v1515_v30, 0.0 }
 0x4b4   :  { %v1244_v4 = vpop.f32.mrb[12].mxu0  ;;  %v1508_v38 = vsel %vm1468_vm14, %v1025_v61, %v2533_v31 }
 0x4b5   :  { %v1479_v5 = vmin.f32 %v1244_v4, 0.0  ;;  %v2685_v6 = vpop.f32.mrb[13].mxu0  ;;  %vm1471_vm13 = vcmp.gt.f32.partialorder %v1244_v4, 0.0  ;;  %v1516_v46 = vadd.f32 %v1508_v38, %v3563_v7 }
 0x4b7   :  { %v1491_v9 = vmul.f32 1.442695, %v1479_v5  ;;  %v1526_v32 = vsel %vm278_vm1, %v1516_v46, 0.0 }
 0x4b8   :  { %v1171_v56 = vpop.f32.mrb[10].mxu1 }
 0x4b9   :  { %2841 = vpow2.f32 %v1491_v9  ;;  %v1478_v10 = vmin.f32 %v1171_v56, 0.0  ;;  %v2680_v11 = vpop.f32.mrb[11].mxu1  ;;  %vm1470_vm15 = vcmp.gt.f32.partialorder %v1171_v56, 0.0 }
 0x4bb   :  { %v1489_v13 = vmul.f32 1.442695, %v1478_v10 }
 0x4bc   :  { %v1317_v14 = vpop.f32.mrb[12].mxu1 }
 0x4bd   :  { %2843 = vpow2.f32 %v1489_v13  ;;  %v1480_v16 = vmin.f32 %v1317_v14, 0.0  ;;  %v2690_v17 = vpop.f32.mrb[13].mxu1  ;;  %vm1472_vm3 = vcmp.gt.f32.partialorder %v1317_v14, 0.0 }
 0x4bf   :  { %v1493_v21 = vmul.f32 1.442695, %v1480_v16 }
 0x4c0   :  { %v1463_v22 = vpop.f32.mrb[14].mxu1 }
 0x4c1   :  { %2845 = vpow2.f32 %v1493_v21  ;;  %v1482_v23 = vmin.f32 %v1463_v22, 0.0  ;;  %v2700_v18 = vpop.f32.mrb[15].mxu1  ;;  %vm1474_vm5 = vcmp.gt.f32.partialorder %v1463_v22, 0.0 }
 0x4c3   :  { %v2842_v27 = vpop.eup %2841  ;;  %v1497_v28 = vmul.f32 1.442695, %v1482_v23 }
 0x4c4   :  { %v2536_v29 = vadd.f32 -1.0, %v2842_v27 }
 0x4c5   :  { %2847 = vpow2.f32 %v1497_v28 }
 0x4c6   :  { %v1511_v33 = vsel %vm1471_vm13, %v1244_v4, %v2536_v29 }
 0x4c7   :  { %v2844_v34 = vpop.eup %2843  ;;  %v1519_v36 = vadd.f32 %v1511_v33, %v3565_v8 }
 0x4c8   :  { %v2535_v42 = vadd.f32 -1.0, %v2844_v34 }
 0x4c9   :  { %v1524_v40 = vsel %vm278_vm1, %v1519_v36, 0.0 }
 0x4ca   :  { %v1525_v39 = vadd.f32 %v1524_v40, %v1523_v37  ;;  %v1510_v51 = vsel %vm1470_vm15, %v1171_v56, %v2535_v42 }
 0x4cb   :  { %v2846_v45 = vpop.eup %2845  ;;  %v1518_v50 = vadd.f32 %v1510_v51, %v3563_v7 }
 0x4cc   :  { %v1536_v41 = vmul.f32 0.5, %v1525_v39  ;;  %v2537_v47 = vadd.f32 -1.0, %v2846_v45 }
 0x4cd   :  { %v1532_v63 = vsel %vm278_vm1, %v1518_v50, 0.0 }
 0x4ce   :  { %v1540_v48 = vsel %vm278_vm1, %v1536_v41, 0.0  ;;  %v1512_v25 = vsel %vm1472_vm3, %v1317_v14, %v2537_v47 }
 0x4cf   :  { %v2848_v52 = vpop.eup %2847  ;;  %v1541_v44 = vrot.slane %v1540_v48, 4  ;;  %v1520_v53 = vadd.f32 %v1512_v25, %v3565_v8 }
 0x4d0   :  { %v2539_v54 = vadd.f32 -1.0, %v2848_v52 }
 0x4d1   :  { %v1542_v55 = vadd.f32 %v1541_v44, %v1540_v48  ;;  %v1527_v15 = vsel %vm278_vm1, %v1520_v53, 0.0 }
 0x4d2   :  { %v1528_v57 = vadd.f32 %v1527_v15, %v1526_v32  ;;  %v1514_v58 = vsel %vm1474_vm5, %v1463_v22, %v2539_v54 }
 0x4d3   :  { %v1543_v59 = vrot.slane %v1542_v55, 2  ;;  %v1522_v60 = vadd.f32 %v1514_v58, %v3565_v8  ;;  %v1477_v8 = vmin.f32 %v3767_v49, 0.0 }
 0x4d4   :  { %v1537_v61 = vmul.f32 0.5, %v1528_v57 }
 0x4d5   :  { %v1544_v62 = vadd.f32 %v1543_v59, %v1542_v55  ;;  %v1533_v43 = vsel %vm278_vm1, %v1522_v60, 0.0  ;;  %v1487_v23 = vmul.f32 1.442695, %v1477_v8 }
 0x4d6   :  { %v1547_v0 = vsel %vm278_vm1, %v1537_v61, 0.0  ;;  %v1534_v2 = vadd.f32 %v1533_v43, %v1532_v63 }
 0x4d7   :  { %v1545_v3 = vrot.slane %v1544_v62, 1  ;;  %v1548_v4 = vrot.slane %v1547_v0, 4  ;;  %2849 = vpow2.f32 %v1487_v23 }
 0x4d8   :  { %v1539_v7 = vmul.f32 0.5, %v1534_v2 }
 0x4d9   :  { %v1546_v5 = vadd.f32 %v1545_v3, %v1544_v62  ;;  %v1549_v6 = vadd.f32 %v1548_v4, %v1547_v0 }
 0x4da   :  { %v1561_v9 = vsel %vm278_vm1, %v1539_v7, 0.0 }
 0x4db   :  { %v1569_v56 = vmul.f32 0.125, %v1546_v5  ;;  %v1550_v10 = vrot.slane %v1549_v6, 2  ;;  %v1562_v11 = vrot.slane %v1561_v9, 4 }
 0x4dd   :  { %v3785_v12 = vsub.f32 %v1515_v30, %v1569_v56  ;;  %v3787_v13 = vsub.f32 %v1519_v36, %v1569_v56  ;;  %v1551_v14 = vadd.f32 %v1550_v10, %v1549_v6  ;;  %v1563_v16 = vadd.f32 %v1562_v11, %v1561_v9 }
 0x4df   :  { %v1581_v17 = vmul.f32 %v3785_v12, %v3785_v12  ;;  %v1585_v20 = vmul.f32 %v3787_v13, %v3787_v13  ;;  %v1552_v21 = vrot.slane %v1551_v14, 1  ;;  %v1564_v22 = vrot.slane %v1563_v16, 2 }
 0x4e1   :  { %v1589_v18 = vsel %vm278_vm1, %v1581_v17, 0.0  ;;  %v1590_v24 = vsel %vm278_vm1, %v1585_v20, 0.0  ;;  %v1553_v26 = vadd.f32 %v1552_v21, %v1551_v14  ;;  %v1565_v27 = vadd.f32 %v1564_v22, %v1563_v16  ;;  %v2850_v59 = vpop.eup %2849  ;;  %v3820_v17 = vld [vmem:[#allocation3] sm:$0xff] }
 0x4e2   :  { %v1591_v28 = vadd.f32 %v1590_v24, %v1589_v18  ;;  %v2534_v43 = vadd.f32 -1.0, %v2850_v59  ;;  %v3823_v24 = vld [vmem:[#allocation3 + $0x8] sm:$0xff] }
 0x4e3   :  { %v1570_v29 = vmul.f32 0.125, %v1553_v26  ;;  %v1566_v30 = vrot.slane %v1565_v27, 1 }
 0x4e4   :  { %v1601_v31 = vmul.f32 0.5, %v1591_v28  ;;  %v1509_v9 = vsel %vm1469_vm6, %v3767_v49, %v2534_v43 }
 0x4e5   :  { %v3795_v33 = vsub.f32 %v1516_v46, %v1570_v29  ;;  %v3797_v34 = vsub.f32 %v1520_v53, %v1570_v29  ;;  %v1567_v36 = vadd.f32 %v1566_v30, %v1565_v27  ;;  %v1517_v20 = vadd.f32 %v3820_v17, %v1509_v9  ;;  %v2547_v9 = vld [vmem:[#allocation9 + $0x3] ss:$0 sm:$0xff] }
 0x4e6   :  { %v1605_v37 = vsel %vm278_vm1, %v1601_v31, 0.0 }
 0x4e7   :  { %v1606_v38 = vrot.slane %v1605_v37, 4  ;;  %v1582_v40 = vmul.f32 %v3795_v33, %v3795_v33  ;;  %v1586_v39 = vmul.f32 %v3797_v34, %v3797_v34  ;;  %v1572_v42 = vmul.f32 0.125, %v1567_v36  ;;  %v1390_v45 = vpop.f32.mrb[14].mxu0 }
 0x4e8   :  { %v1481_v41 = vmin.f32 %v1390_v45, 0.0  ;;  %v2695_v47 = vpop.f32.mrb[15].mxu0  ;;  %vm1473_vm7 = vcmp.gt.f32.partialorder %v1390_v45, 0.0  ;;  %v1529_v27 = vsel %vm278_vm1, %v1517_v20, 0.0 }
 0x4e9   :  { %v1607_v48 = vadd.f32 %v1606_v38, %v1605_v37  ;;  %v1592_v46 = vsel %vm278_vm1, %v1582_v40, 0.0  ;;  %v1593_v51 = vsel %vm278_vm1, %v1586_v39, 0.0  ;;  %v3806_v25 = vsub.f32 %v1518_v50, %v1572_v42  ;;  %v2540_v39 = vld [vmem:[#allocation8] ss:$0 sm:$0xff] }
 0x4ea   :  { %v1594_v52 = vadd.f32 %v1593_v51, %v1592_v46  ;;  %v3808_v44 = vsub.f32 %v1522_v60, %v1572_v42  ;;  %v1495_v53 = vmul.f32 1.442695, %v1481_v41  ;;  %v2544_v46 = vld [vmem:[#allocation9] ss:$0 sm:$0xff] }
 0x4eb   :  { %v1608_v32 = vrot.slane %v1607_v48, 2  ;;  %v1584_v54 = vmul.f32 %v3806_v25, %v3806_v25 }
 0x4ec   :  { %v1602_v55 = vmul.f32 0.5, %v1594_v52  ;;  %v1588_v15 = vmul.f32 %v3808_v44, %v3808_v44  ;;  %2851 = vpow2.f32 %v1495_v53 }
 0x4ed   :  { %v1609_v57 = vadd.f32 %v1608_v32, %v1607_v48  ;;  %v1598_v58 = vsel %vm278_vm1, %v1584_v54, 0.0 }
 0x4ee   :  { %v1612_v50 = vsel %vm278_vm1, %v1602_v55, 0.0  ;;  %v1599_v61 = vsel %vm278_vm1, %v1588_v15, 0.0  ;;  %v2799_v15 = vld [vmem:[#allocation11 + $0x20] sm:$0xff]  }
 0x4ef   :  { %v1610_v60 = vrot.slane %v1609_v57, 1  ;;  %v1613_v62 = vrot.slane %v1612_v50, 4  ;;  %v1600_v63 = vadd.f32 %v1599_v61, %v1598_v58 }
 0x4f1   :  { %v1611_v0 = vadd.f32 %v1610_v60, %v1609_v57  ;;  %v1614_v2 = vadd.f32 %v1613_v62, %v1612_v50  ;;  %v1604_v3 = vmul.f32 0.5, %v1600_v63  ;;  %v2541_v50 = vld [vmem:[#allocation8 + $0x1] ss:$0 sm:$0xff]  ;;  %v2545_v60 = vld [vmem:[#allocation9 + $0x1] ss:$0 sm:$0xff]  ;;  %v2800_v62 = vld [vmem:[#allocation11 + $0x28] sm:$0xff]  }
 0x4f3   :  { %v1633_v4 = vmul.f32 0.125, %v1611_v0  ;;  %v1615_v7 = vrot.slane %v1614_v2, 2  ;;  %v1626_v5 = vsel %vm278_vm1, %v1604_v3, 0.0 }
 0x4f4   :  { %v1627_v6 = vrot.slane %v1626_v5, 4 }
 0x4f5   :  { %v1637_v56 = vadd.f32 1e-05, %v1633_v4  ;;  %v1616_v10 = vadd.f32 %v1615_v7, %v1614_v2  ;;  %v2543_v4 = vld [vmem:[#allocation8 + $0x3] ss:$0 sm:$0xff] }
 0x4f6   :  { %v2852_v11 = vpop.eup %2851  ;;  %v1628_v8 = vadd.f32 %v1627_v6, %v1626_v5  ;;  %v2797_v6 = vld [vmem:[#allocation11 + $0x30] sm:$0xff]  }
 0x4f7   :  { %2853 = vrsqrt.f32 %v1637_v56  ;;  %v1617_v14 = vrot.slane %v1616_v10, 1  ;;  %v2538_v16 = vadd.f32 -1.0, %v2852_v11 }
 0x4f8   :  { %v1629_v21 = vrot.slane %v1628_v8, 2 }
 0x4f9   :  { %v1618_v22 = vadd.f32 %v1617_v14, %v1616_v10  ;;  %v1513_v23 = vsel %vm1473_vm7, %v1390_v45, %v2538_v16 }
 0x4fa   :  { %v1630_v18 = vadd.f32 %v1629_v21, %v1628_v8  ;;  %v1521_v49 = vadd.f32 %v3823_v24, %v1513_v23  ;;  %v2798_v23 = vld [vmem:[#allocation11 + $0x38] sm:$0xff]  }
 0x4fb   :  { %v1634_v26 = vmul.f32 0.125, %v1618_v22 }
 0x4fc   :  { %v1631_v28 = vrot.slane %v1630_v18, 1  ;;  %v1530_v29 = vsel %vm278_vm1, %v1521_v49, 0.0 }
 0x4fd   :  { %v1638_v30 = vadd.f32 1e-05, %v1634_v26  ;;  %v1531_v31 = vadd.f32 %v1530_v29, %v1529_v27 }
 0x4fe   :  { %v1632_v36 = vadd.f32 %v1631_v28, %v1630_v18 }
 0x4ff   :  { %2855 = vrsqrt.f32 %v1638_v30  ;;  %v1538_v37 = vmul.f32 0.5, %v1531_v31 }
 0x500   :  { %v1636_v38 = vmul.f32 0.125, %v1632_v36 }
 0x501   :  { %v2854_v40 = vpop.eup %2853  ;;  %v1554_v42 = vsel %vm278_vm1, %v1538_v37, 0.0 }
 0x502   :  { %v1645_v45 = vmul.f32 %v2854_v40, %v3785_v12  ;;  %v1649_v41 = vmul.f32 %v2854_v40, %v3787_v13  ;;  %v1640_v47 = vadd.f32 1e-05, %v1636_v38  ;;  %v1555_v48 = vrot.slane %v1554_v42, 4 }
 0x504   :  { %v1681_v51 = vmul.f32 %v2540_v39, %v1645_v45  ;;  %v1685_v52 = vmul.f32 %v2540_v39, %v1649_v41  ;;  %2857 = vrsqrt.f32 %v1640_v47  ;;  %v1556_v53 = vadd.f32 %v1555_v48, %v1554_v42  ;;  %v2542_v42 = vld [vmem:[#allocation8 + $0x2] ss:$0 sm:$0xff]  ;;  %v2546_v47 = vld [vmem:[#allocation9 + $0x2] ss:$0 sm:$0xff] }
 0x506   :  { %v1721_v32 = vadd.f32 %v2544_v46, %v1685_v52  ;;  %v1557_v54 = vrot.slane %v1556_v53, 2  ;;  %v1717_v55 = vadd.f32 %v2544_v46, %v1681_v51 }
 0x508   :  { %v1558_v57 = vadd.f32 %v1557_v54, %v1556_v53  ;;  %v1725_v58 = vpack.c.bf16 %v1721_v32, %v1717_v55 }
 0x509   :  { %v2856_v59 = vpop.eup %2855 }
 0x50a   :  { %v1646_v61 = vmul.f32 %v2856_v59, %v3795_v33  ;;  %v1650_v12 = vmul.f32 %v2856_v59, %v3797_v34  ;;  %v1559_v13 = vrot.slane %v1558_v57, 1  ;;  %2706 = vmatmul.mubr.msk.bf16.vlgmr.msra.gmra.mrb[16].mxu0 %vm278_vm1, %v1725_v58 }
 0x50b   :  { %2718 = vmatpush3.bf16.msra.mxu0 %v2799_v15  ;;  %2721 = vmatprep.mubr.msk.bf16.mxu0 %vm3248_vm0, %v3247_v1 }
 0x50c   :  { %v1682_v63 = vmul.f32 %v2541_v50, %v1646_v61  ;;  %v1686_v43 = vmul.f32 %v2541_v50, %v1650_v12  ;;  %v1560_v0 = vadd.f32 %v1559_v13, %v1558_v57  ;;  %2719 = vmatprep.subr.bf16.mxu0 %v3247_v1 }
 0x50e   :  { %v2858_v2 = vpop.eup %2857  ;;  %v1722_v3 = vadd.f32 %v2545_v60, %v1686_v43  ;;  %v1571_v33 = vmul.f32 0.125, %v1560_v0  ;;  %v1718_v7 = vadd.f32 %v2545_v60, %v1682_v63 }
 0x50f   :  { %v1648_v34 = vmul.f32 %v2858_v2, %v3806_v25  ;;  %v1652_v5 = vmul.f32 %v2858_v2, %v3808_v44  ;;  %2720 = vmatpush3.bf16.msra.mxu0 %v2800_v62 }
 0x510   :  { %v1575_v56 = vsub.f32 %v1517_v20, %v1571_v33  ;;  %v1579_v10 = vsub.f32 %v1521_v49, %v1571_v33  ;;  %v1726_v11 = vpack.c.bf16 %v1722_v3, %v1718_v7  ;;  %2733 = vmatprep.subr.mxu0 %v3247_v1 }
 0x511   :  { %v1684_v8 = vmul.f32 %v2543_v4, %v1648_v34  ;;  %v1688_v14 = vmul.f32 %v2543_v4, %v1652_v5 }
 0x512   :  { %v1583_v16 = vmul.f32 %v1575_v56, %v1575_v56  ;;  %v1587_v21 = vmul.f32 %v1579_v10, %v1579_v10  ;;  %2714 = vmatmul.mubr.msk.bf16.vlgmr.msra.gmra.mrb[16].mxu1 %vm278_vm1, %v1726_v11 }
 0x513   :  { %v1724_v22 = vadd.f32 %v2547_v9, %v1688_v14  ;;  %2726 = vmatpush3.bf16.msra.mxu1 %v2797_v6  ;;  %2729 = vmatprep.mubr.msk.bf16.mxu1 %vm3248_vm0, %v3247_v1  ;;  %v1720_v25 = vadd.f32 %v2547_v9, %v1684_v8 }
 0x514   :  { %v1595_v44 = vsel %vm278_vm1, %v1583_v16, 0.0  ;;  %v1596_v20 = vsel %vm278_vm1, %v1587_v21, 0.0  ;;  %2727 = vmatprep.subr.bf16.mxu1 %v3247_v1  ;;  %v2560_v16 = vld [vmem:[%s3926_s8] ss:$0 sm:$0xff]  ;;  %s3250_s8 = smov [#allocation26]  }
 0x515   :  { %v1597_v18 = vadd.f32 %v1596_v20, %v1595_v44  ;;  %v1728_v49 = vpack.c.bf16 %v1724_v22, %v1720_v25  ;;  %s2481_s9 = sshll.u32 %s3250_s8, 4  ;;  %s2482_s9 = int_to_ptr.vmem [resolvable:$true] %s2481_s9 }
 0x516   :  { %s3187_s11 = scalar_lea.vmem %s2482_s9, 256  ;;  %p3192_p1 = scmp.lt.s32.totalorder %s2482_s9, %s2482_s9 }
 0x517   :  { %v1603_v26 = vmul.f32 0.5, %v1597_v18  ;;  %2728 = vmatpush3.bf16.msra.mxu1 %v2798_v23  ;;  %p3188_p0 = scmp.ne.s32.totalorder %s2482_s9, %s3187_s11  ;;  %p3193_p2 = scmp.lt.s32.totalorder %s3187_s11, %s3187_s11 }
 0x518   :  { %2738 = vmatprep.subr.mxu1 %v3247_v1 }
 0x519   :  { %v1619_v27 = vsel %vm278_vm1, %v1603_v26, 0.0  ;;  %p3194_p3 = por %p3193_p2, %p3192_p1 }
 0x51a   :  { %v1620_v28 = vrot.slane %v1619_v27, 4  ;;  %2730 = vmatmul.mubr.msk.bf16.vlgmr.msra.gmra.mrb[20].mxu1 %vm278_vm1, %v1728_v49 }
 0x51b   :  { %2740 = vmatprep.mubr.msk.f32.mxu1 %vm3248_vm0, %v3247_v1  ;;  %p3195_p4 = pnand %p3194_p3, %p3188_p0 }
 0x51c   :  { %v1621_v29 = vadd.f32 %v1620_v28, %v1619_v27  ;;  %v2562_v27 = vld [vmem:[#allocation2] ss:$0 sm:$0xff] }
 0x51e   :  { %v1622_v30 = vrot.slane %v1621_v29, 2 }
 0x520   :  { %v1623_v31 = vadd.f32 %v1622_v30, %v1621_v29 }
 0x522   :  { %v1624_v36 = vrot.slane %v1623_v31, 1 }
 0x524   :  { %v1625_v37 = vadd.f32 %v1624_v36, %v1623_v31 }
 0x526   :  { %v1635_v38 = vmul.f32 0.125, %v1625_v37 }
 0x528   :  { %v1639_v40 = vadd.f32 1e-05, %v1635_v38 }
 0x52a   :  { %2859 = vrsqrt.f32 %v1639_v40 }
 0x534   :  { %v2860_v39 = vpop.eup %2859 }
 0x535   :  { %v1647_v45 = vmul.f32 %v2860_v39, %v1575_v56  ;;  %v1651_v41 = vmul.f32 %v2860_v39, %v1579_v10  ;;  %v2561_v10 = vld [vmem:[#allocation12] ss:$0 sm:$0xff] }
 0x537   :  { %v1683_v48 = vmul.f32 %v2542_v42, %v1647_v45  ;;  %v1687_v46 = vmul.f32 %v2542_v42, %v1651_v41 }
 0x539   :  { %v1723_v51 = vadd.f32 %v2546_v47, %v1687_v46  ;;  %v1719_v52 = vadd.f32 %v2546_v47, %v1683_v48 }
 0x53b   :  { %v1727_v53 = vpack.c.bf16 %v1723_v51, %v1719_v52 }
 0x53d   :  { %2722 = vmatmul.mubr.msk.bf16.vlgmr.msra.gmra.mrb[20].mxu0 %vm278_vm1, %v1727_v53 }
 0x53e   :  { %2735 = vmatprep.mubr.msk.f32.mxu0 %vm3248_vm0, %v3247_v1 }
 0x5dd   :  { %v1794_v32 = vpop.f32.mrb[16].mxu0 }
 0x5de   :  { %v2707_v54 = vpop.f32.mrb[17].mxu0  ;;  %v1969_v58 = vsel %vm278_vm1, %v1794_v32, 0.0 }
 0x5df   :  { %v1797_v55 = vpop.f32.mrb[18].mxu0 }
 0x5e0   :  { %v2708_v15 = vpop.f32.mrb[19].mxu0  ;;  %v1976_v13 = vsel %vm278_vm1, %v1797_v55, 0.0 }
 0x5e5   :  { %v1850_v57 = vpop.f32.mrb[16].mxu1 }
 0x5e6   :  { %v1970_v59 = vsel %vm278_vm1, %v1850_v57, 0.0  ;;  %v2715_v50 = vpop.f32.mrb[17].mxu1 }
 0x5e7   :  { %v1971_v61 = vadd.f32 %v1970_v59, %v1969_v58  ;;  %v1853_v12 = vpop.f32.mrb[18].mxu1 }
 0x5e8   :  { %v1977_v60 = vsel %vm278_vm1, %v1853_v12, 0.0  ;;  %v2716_v62 = vpop.f32.mrb[19].mxu1 }
 0x5e9   :  { %v1978_v63 = vadd.f32 %v1977_v60, %v1976_v13 }
 0x5ed   :  { %v1962_v43 = vpop.f32.mrb[20].mxu1 }
 0x5ee   :  { %v2731_v0 = vpop.f32.mrb[21].mxu1  ;;  %v1974_v6 = vsel %vm278_vm1, %v1962_v43, 0.0 }
 0x5ef   :  { %v1965_v2 = vpop.f32.mrb[22].mxu1  ;;  %v2801_v0 = vld [vmem:[#allocation17] sm:$0xff]  }
 0x5f0   :  { %v2732_v3 = vpop.f32.mrb[23].mxu1  ;;  %v1981_v14 = vsel %vm278_vm1, %v1965_v2, 0.0  ;;  %v2802_v2 = vld [vmem:[#allocation17 + $0x8] sm:$0xff]  }
 0x610   :  { %v1906_v4 = vpop.f32.mrb[20].mxu0 }
 0x611   :  { %v1972_v33 = vsel %vm278_vm1, %v1906_v4, 0.0  ;;  %v2723_v7 = vpop.f32.mrb[21].mxu0 }
 0x612   :  { %v1973_v34 = vadd.f32 %v1972_v33, %v1971_v61  ;;  %v1909_v5 = vpop.f32.mrb[22].mxu0 }
 0x613   :  { %v1979_v9 = vsel %vm278_vm1, %v1909_v5, 0.0  ;;  %v2724_v56 = vpop.f32.mrb[23].mxu0 }
 0x614   :  { %v1975_v11 = vadd.f32 %v1974_v6, %v1973_v34  ;;  %v1980_v8 = vadd.f32 %v1979_v9, %v1978_v63 }
 0x616   :  { %v1982_v21 = vadd.f32 %v1981_v14, %v1980_v8  ;;  %2734 = vmatpush3.msra.mxu0 %v1975_v11  ;;  %v2005_v22 = vmul.f32 %v2561_v10, %v1975_v11  ;;  %v1990_v44 = vmul.f32 %v2560_v16, %v1975_v11 }
 0x617   :  { %2743 = vmatprep.subr.bf16.mxu0 %v3247_v1 }
 0x618   :  { %2739 = vmatpush3.msra.mxu1 %v1982_v21  ;;  %v2007_v23 = vsel %vm278_vm1, %v2005_v22, 0.0  ;;  %v2006_v25 = vmul.f32 %v2561_v10, %v1982_v21  ;;  %v1991_v18 = vmul.f32 %v2560_v16, %v1982_v21  ;;  %v1992_v49 = vsel %vm278_vm1, %v1990_v44, 0.0 }
 0x619   :  { %2008 = vadd.xlane.f32.xlu0 %v2007_v23  ;;  %2751 = vmatprep.subr.bf16.mxu1 %v3247_v1 }
 0x61a   :  { %v2010_v20 = vsel %vm278_vm1, %v2006_v25, 0.0  ;;  %v1995_v26 = vsel %vm278_vm1, %v1991_v18, 0.0 }
 0x61b   :  { %2011 = vadd.xlane.f32.xlu1 %v2010_v20 }
 0x61d   :  { %1993 = vadd.xlane.f32.xlu0 %v1992_v49 }
 0x61f   :  { %1996 = vadd.xlane.f32.xlu1 %v1995_v26 }
 0x633   :  { %2046 = vperm.xlu0 %2784, %v2562_v27  }
 0x6a6   :  { %v2009_v28 = vpop.xlane.xlu0 %2008 }
 0x6a7   :  { %v2018_v36 = vrot.slane %v2009_v28, %v3667_v19 }
 0x6a8   :  { %v2012_v29 = vpop.xlane.xlu1 %2011 }
 0x6a9   :  { %v2022_v37 = vrot.slane %v2012_v29, %v3667_v19 }
 0x6aa   :  { %v1994_v30 = vpop.xlane.xlu0 %1993 }
 0x6ab   :  { %v2037_v38 = vadd.f32 %v2018_v36, %v1994_v30 }
 0x6ac   :  { %v1997_v31 = vpop.xlane.xlu1 %1996 }
 0x6ad   :  { %v2038_v40 = vadd.f32 %v2022_v37, %v1997_v31 }
 0x6b2   :  { %v2047_v39 = vpop.permute.xlu0 %2046 }
 0x6b3   :  { %v2049_v42 = vadd.f32 %v2047_v39, %v2037_v38  ;;  %v2050_v45 = vadd.f32 %v2047_v39, %v2038_v40 }
 0x6b5   :  { %v2053_v41 = vmul.f32 0.2, %v2049_v42  ;;  %v2054_v47 = vmul.f32 0.2, %v2050_v45  ;;  %vm2051_vm8 = vcmp.gt.f32.partialorder %v2049_v42, 0.0  ;;  %vm2052_vm9 = vcmp.gt.f32.partialorder %v2050_v45, 0.0 }
 0x6b7   :  { %v2055_v48 = vsel %vm2051_vm8, %v2049_v42, %v2053_v41  ;;  %v2056_v46 = vsel %vm2052_vm9, %v2050_v45, %v2054_v47 }
 0x6b8   :  { %v2057_v51 = vsel %vm3672_vm2, -9e+15, %v2055_v48  ;;  %v2058_v19 = vsel %vm3672_vm2, -9e+15, %v2056_v46 }
 0x6b9   :  { %v2059_v52 = vsel %vm794_vm4, %v2057_v51, -inf  ;;  %v2062_v53 = vsel %vm794_vm4, %v2058_v19, -inf }
 0x6ba   :  { %2060 = vmax.xlane.f32.xlu1 %v2059_v52  ;;  %v2567_v52 = vld [vmem:[#allocation14] ss:$0 sm:$0xff] }
 0x6be   :  { %2063 = vmax.xlane.f32.xlu1 %v2062_v53 }
 0x747   :  { %v2061_v32 = vpop.xlane.xlu1 %2060 }
 0x748   :  { %v2065_v54 = vsub.f32 %v2057_v51, %v2061_v32  ;;  %v2568_v32 = vld [vmem:[#allocation15] ss:$0 sm:$0xff] }
 0x74a   :  { %v2067_v55 = vmul.f32 1.442695, %v2065_v54 }
 0x74b   :  { %v2064_v15 = vpop.xlane.xlu1 %2063 }
 0x74c   :  { %2861 = vpow2.f32 %v2067_v55  ;;  %v2066_v57 = vsub.f32 %v2058_v19, %v2064_v15 }
 0x74e   :  { %v2069_v58 = vmul.f32 1.442695, %v2066_v57 }
 0x750   :  { %2863 = vpow2.f32 %v2069_v58 }
 0x756   :  { %v2862_v59 = vpop.eup %2861 }
 0x757   :  { %v2071_v50 = vsel %vm794_vm4, %v2862_v59, 0.0 }
 0x758   :  { %2072 = vadd.xlane.f32.xlu1 %v2071_v50  ;;  %v2804_v50 = vld [vmem:[#allocation20 + $0x8] sm:$0xff]  }
 0x75a   :  { %v2864_v61 = vpop.eup %2863 }
 0x75b   :  { %v2074_v12 = vsel %vm794_vm4, %v2864_v61, 0.0 }
 0x75c   :  { %2075 = vadd.xlane.f32.xlu1 %v2074_v12 }
 0x7e5   :  { %v2073_v35 = vpop.xlane.xlu1 %2072 }
 0x7e6   :  { %2865 = vrcp.f32 %v2073_v35 }
 0x7e9   :  { %v2076_v13 = vpop.xlane.xlu1 %2075 }
 0x7ea   :  { %2867 = vrcp.f32 %v2076_v13 }
 0x7f0   :  { %v2866_v60 = vpop.eup %2865 }
 0x7f1   :  { %v2078_v62 = vmul.f32 %v2866_v60, %v2862_v59  ;;  %v2803_v59 = vld [vmem:[#allocation20] sm:$0xff]  }
 0x7f3   :  { %2736 = vmatmul.mubr.msk.f32.vlgmr.msra.gmra.mrb[24].mxu0 %vm794_vm4, %v2078_v62 }
 0x7f4   :  { %v2868_v63 = vpop.eup %2867  ;;  %2747 = vmatprep.mubr.msk.bf16.mxu0 %vm3248_vm0, %v3247_v1  ;;  %2744 = vmatpush3.bf16.msra.mxu0 %v2801_v0 }
 0x7f5   :  { %v2080_v43 = vmul.f32 %v2868_v63, %v2864_v61  ;;  %2745 = vmatprep.subr.bf16.mxu0 %v3247_v1  ;;  %v2569_v61 = vld [vmem:[#allocation18] ss:$0 sm:$0xff] }
 0x7f7   :  { %2741 = vmatmul.mubr.msk.f32.vlgmr.msra.gmra.mrb[24].mxu1 %vm794_vm4, %v2080_v43 }
 0x7f8   :  { %2755 = vmatprep.mubr.msk.bf16.mxu1 %vm3248_vm0, %v3247_v1  ;;  %2746 = vmatpush3.bf16.msra.mxu0 %v2802_v2 }
 0x7f9   :  { %2752 = vmatpush3.bf16.msra.mxu1 %v2803_v59 }
 0x7fa   :  { %2753 = vmatprep.subr.bf16.mxu1 %v3247_v1 }
 0x7fd   :  { %2754 = vmatpush3.bf16.msra.mxu1 %v2804_v50 }
 0x8c6   :  { %v2150_v3 = vpop.f32.mrb[24].mxu0 }
 0x8c7   :  { %v2229_v4 = vmin.f32 %v2150_v3, 0.0  ;;  %v2737_v33 = vpop.f32.mrb[25].mxu0  ;;  %vm2227_vm2 = vcmp.gt.f32.partialorder %v2150_v3, 0.0 }
 0x8c9   :  { %v2231_v7 = vmul.f32 1.442695, %v2229_v4 }
 0x8ca   :  { %v2223_v34 = vpop.f32.mrb[24].mxu1 }
 0x8cb   :  { %2869 = vpow2.f32 %v2231_v7  ;;  %v2230_v5 = vmin.f32 %v2223_v34, 0.0  ;;  %v2742_v6 = vpop.f32.mrb[25].mxu1  ;;  %vm2228_vm0 = vcmp.gt.f32.partialorder %v2223_v34, 0.0 }
 0x8cd   :  { %v2233_v9 = vmul.f32 1.442695, %v2230_v5 }
 0x8cf   :  { %2871 = vpow2.f32 %v2233_v9 }
 0x8d5   :  { %v2870_v56 = vpop.eup %2869 }
 0x8d6   :  { %v2565_v10 = vadd.f32 -1.0, %v2870_v56 }
 0x8d8   :  { %v2237_v11 = vsel %vm2227_vm2, %v2150_v3, %v2565_v10  ;;  %v2573_v3 = vld [vmem:[#allocation21] ss:$0 sm:$0xff] }
 0x8d9   :  { %v2872_v8 = vpop.eup %2871  ;;  %v2239_v16 = vadd.f32 %v3820_v17, %v2237_v11 }
 0x8da   :  { %v2566_v14 = vadd.f32 -1.0, %v2872_v8 }
 0x8db   :  { %v2243_v23 = vsel %vm278_vm1, %v2239_v16, 0.0 }
 0x8dc   :  { %v2238_v21 = vsel %vm2228_vm0, %v2223_v34, %v2566_v14 }
 0x8dd   :  { %v2240_v22 = vadd.f32 %v3823_v24, %v2238_v21 }
 0x8df   :  { %v2244_v25 = vsel %vm278_vm1, %v2240_v22, 0.0 }
 0x8e0   :  { %v2245_v44 = vadd.f32 %v2244_v25, %v2243_v23 }
 0x8e2   :  { %v2246_v20 = vrot.slane %v2245_v44, 4 }
 0x8e4   :  { %v2247_v18 = vadd.f32 %v2246_v20, %v2245_v44 }
 0x8e6   :  { %v2248_v49 = vrot.slane %v2247_v18, 2 }
 0x8e8   :  { %v2249_v26 = vadd.f32 %v2248_v49, %v2247_v18 }
 0x8ea   :  { %v2250_v27 = vrot.slane %v2249_v26, 1 }
 0x8ec   :  { %v2251_v28 = vadd.f32 %v2250_v27, %v2249_v26 }
 0x8ee   :  { %v2253_v29 = vmul.f32 0.0625, %v2251_v28 }
 0x8f0   :  { %v2254_v30 = vsub.f32 %v2239_v16, %v2253_v29  ;;  %v2255_v31 = vsub.f32 %v2240_v22, %v2253_v29 }
 0x8f2   :  { %v2256_v36 = vmul.f32 %v2254_v30, %v2254_v30  ;;  %v2257_v17 = vmul.f32 %v2255_v31, %v2255_v31 }
 0x8f4   :  { %v2258_v37 = vsel %vm278_vm1, %v2256_v36, 0.0  ;;  %v2259_v24 = vsel %vm278_vm1, %v2257_v17, 0.0 }
 0x8f5   :  { %v2260_v38 = vadd.f32 %v2259_v24, %v2258_v37 }
 0x8f7   :  { %v2261_v40 = vrot.slane %v2260_v38, 4 }
 0x8f9   :  { %v2262_v39 = vadd.f32 %v2261_v40, %v2260_v38 }
 0x8fb   :  { %v2263_v42 = vrot.slane %v2262_v39, 2 }
 0x8fd   :  { %v2264_v45 = vadd.f32 %v2263_v42, %v2262_v39  ;;  %v2577_v39 = vld [vmem:[#allocation23] ss:$0 sm:$0xff] }
 0x8ff   :  { %v2265_v41 = vrot.slane %v2264_v45, 1 }
 0x901   :  { %v2266_v47 = vadd.f32 %v2265_v41, %v2264_v45  ;;  %v2578_v41 = vld [vmem:[#allocation24] ss:$0 sm:$0xff] }
 0x903   :  { %v2267_v48 = vmul.f32 0.0625, %v2266_v47 }
 0x905   :  { %v2268_v46 = vadd.f32 1e-05, %v2267_v48 }
 0x907   :  { %2873 = vrsqrt.f32 %v2268_v46 }
 0x911   :  { %v2874_v51 = vpop.eup %2873 }
 0x912   :  { %v2270_v19 = vmul.f32 %v2874_v51, %v2254_v30  ;;  %v2271_v53 = vmul.f32 %v2874_v51, %v2255_v31 }
 0x914   :  { %v2278_v54 = vmul.f32 %v2567_v52, %v2270_v19  ;;  %v2279_v55 = vmul.f32 %v2567_v52, %v2271_v53 }
 0x916   :  { %v2287_v15 = vadd.f32 %v2568_v32, %v2279_v55  ;;  %v2286_v57 = vadd.f32 %v2568_v32, %v2278_v54 }
 0x918   :  { %v2288_v58 = vpack.c.bf16 %v2287_v15, %v2286_v57 }
 0x91a   :  { %2748 = vmatmul.mubr.msk.bf16.vlgmr.msra.gmra.mrb[28].mxu0 %vm278_vm1, %v2288_v58 }
 0x9ed   :  { %v2349_v12 = vpop.f32.mrb[28].mxu0 }
 0x9ee   :  { %v2350_v35 = vadd.f32 %v2569_v61, %v2349_v12  ;;  %v2749_v13 = vpop.f32.mrb[29].mxu0 }
 0x9ef   :  { %v2352_v60 = vpop.f32.mrb[30].mxu0 }
 0x9f0   :  { %v2353_v62 = vadd.f32 %v2569_v61, %v2352_v60  ;;  %v2750_v63 = vpop.f32.mrb[31].mxu0  ;;  %v2356_v43 = vmax.f32 %v2350_v35, 0.0 }
 0x9f2   :  { %v2357_v0 = vmax.f32 %v2353_v62, 0.0 }
 0x9f4   :  { %v2358_v2 = vpack.c.bf16 %v2357_v0, %v2356_v43 }
 0x9f6   :  { %2756 = vmatmul.mubr.msk.bf16.vlgmr.msra.gmra.mrb[28].mxu1 %vm278_vm1, %v2358_v2 }
 0xac9   :  { %v2419_v4 = vpop.f32.mrb[28].mxu1 }
 0xaca   :  { %v2420_v33 = vadd.f32 %v2573_v3, %v2419_v4  ;;  %v2757_v7 = vpop.f32.mrb[29].mxu1 }
 0xacb   :  { %v2422_v34 = vpop.f32.mrb[30].mxu1 }
 0xacc   :  { %v2426_v1 = vadd.f32 %v2420_v33, %v2286_v57  ;;  %v2423_v5 = vadd.f32 %v2573_v3, %v2422_v34  ;;  %v2758_v6 = vpop.f32.mrb[31].mxu1 }
 0xace   :  { %v2427_v9 = vadd.f32 %v2423_v5, %v2287_v15  ;;  %v2430_v56 = vsel %vm278_vm1, %v2426_v1, 0.0 }
 0xad0   :  { %v2431_v10 = vsel %vm278_vm1, %v2427_v9, 0.0 }
 0xad1   :  { %v2432_v11 = vadd.f32 %v2431_v10, %v2430_v56 }
 0xad3   :  { %v2433_v8 = vrot.slane %v2432_v11, 4 }
 0xad5   :  { %v2434_v14 = vadd.f32 %v2433_v8, %v2432_v11 }
 0xad7   :  { %v2435_v16 = vrot.slane %v2434_v14, 2 }
 0xad9   :  { %v2436_v21 = vadd.f32 %v2435_v16, %v2434_v14 }
 0xadb   :  { %v2437_v22 = vrot.slane %v2436_v21, 1 }
 0xadd   :  { %v2438_v23 = vadd.f32 %v2437_v22, %v2436_v21 }
 0xadf   :  { %v2439_v25 = vmul.f32 0.0625, %v2438_v23 }
 0xae1   :  { %v2440_v44 = vsub.f32 %v2426_v1, %v2439_v25  ;;  %v2441_v20 = vsub.f32 %v2427_v9, %v2439_v25 }
 0xae3   :  { %v2442_v18 = vmul.f32 %v2440_v44, %v2440_v44  ;;  %v2443_v49 = vmul.f32 %v2441_v20, %v2441_v20 }
 0xae5   :  { %v2444_v26 = vsel %vm278_vm1, %v2442_v18, 0.0  ;;  %v2445_v27 = vsel %vm278_vm1, %v2443_v49, 0.0 }
 0xae6   :  { %v2446_v28 = vadd.f32 %v2445_v27, %v2444_v26 }
 0xae8   :  { %v2447_v29 = vrot.slane %v2446_v28, 4 }
 0xaea   :  { %v2448_v30 = vadd.f32 %v2447_v29, %v2446_v28 }
 0xaec   :  { %v2449_v31 = vrot.slane %v2448_v30, 2 }
 0xaee   :  { %v2450_v36 = vadd.f32 %v2449_v31, %v2448_v30 }
 0xaf0   :  { %v2451_v17 = vrot.slane %v2450_v36, 1 }
 0xaf2   :  { %v2452_v37 = vadd.f32 %v2451_v17, %v2450_v36 }
 0xaf4   :  { %v2453_v24 = vmul.f32 0.0625, %v2452_v37 }
 0xaf6   :  { %v2454_v38 = vadd.f32 1e-05, %v2453_v24 }
 0xaf8   :  { %2875 = vrsqrt.f32 %v2454_v38 }
 0xb02   :  { %v2876_v40 = vpop.eup %2875 }
 0xb03   :  { %v2456_v42 = vmul.f32 %v2876_v40, %v2440_v44  ;;  %v2457_v45 = vmul.f32 %v2876_v40, %v2441_v20 }
 0xb05   :  { %v2465_v47 = vmul.f32 %v2577_v39, %v2457_v45  ;;  %v2464_v48 = vmul.f32 %v2577_v39, %v2456_v42 }
 0xb07   :  { %v2472_v46 = vadd.f32 %v2578_v41, %v2464_v48  ;;  %v2473_v51 = vadd.f32 %v2578_v41, %v2465_v47 }
 0xb09   :  { %2474 = vst.msk [vmem:[#allocation26] sm:$0xff] %vm278_vm1, %v2472_v46  ;;  %2475 = vst.msk [vmem:[#allocation26 + $0x8] sm:$0xff] %vm278_vm1, %v2473_v51 }
 0xb0a   :  { %3198 = shalt.err (!%p3195_p4)
}
 0xb0b   :  { %s3954_s15 = sld [smem:[#allocation40_spill]] }
 0xb11   :  { %s3199_s5 = scalar_lea.hbm %s3954_s15, 256 }
 0xb12   :  { %p3200_p5 = scmp.ne.s32.totalorder %s3954_s15, %s3199_s5  ;;  %p3203_p6 = scmp.lt.u32.totalorder %s3199_s5, %s3954_s15 }
 0xb14   :  { %p3205_p7 = pnand %p3203_p6, %p3200_p5 }
 0xb16   :  { %3208 = shalt.err (!%p3205_p7)
}
 0xb17   :  { %2487 = dma.vmem_to_hbm [thread:$0]  %s2482_s9, 256, %s3954_s15, [#allocation5], %s3236_s16, %s3236_s16, %s3237_s25  }
 0xb18   :  { %3225 = dma.done.wait [#allocation5], 256  }
 0xb19   :  { %3226 = vsyncadd [#allocation5], 4294967040 }
 0xb1a   :  { %2491 = vsyncpa [#allocation4], 1 }
 0xb1b   :  { %2492 = vsyncpa [#allocation7], 1 }
 0xb1c   :  { %2493 = vsyncpa [#allocation10], 1 }
 0xb1d   :  { %2494 = vsyncpa [#allocation13], 1 }
 0xb1e   :  { %2495 = vsyncpa [#allocation16], 1 }
 0xb1f   :  { %2496 = vsyncpa [#allocation19], 1 }
 0xb20   :  { %2497 = vsyncpa [#allocation22], 1 }
 0xb21   :  { %2498 = vsyncpa [#allocation25], 1 }
 0xb22   :  { %2499 = vsyncpa [#allocation5], 1 }

</bundles_post_ra>
